<compile_context>
chip_gen: v7x
topology: tpu7x:2x2x1
jax: 0.10.0
libtpu: 0.0.40
codegen_flags: <defaults>
</compile_context>

<pallas_src>
import jax
import jax.numpy as jnp
from jax.experimental import pallas as pl
from jax.experimental.pallas import tpu as pltpu


# --------------------------------------------------------------------------
# Fused kernel factory.
# --------------------------------------------------------------------------
def _make_fused_kernel(ti, wo, cin, cout, has_skip, act_dtype, out_dtype):
    tr = 2 * ti  # output rows per block

    def kernel(*refs):
        if has_skip:
            xw_ref, xh_ref, s_ref, sh_ref, w_ref, b_ref, o_ref, u_ref = refs
        else:
            xw_ref, xh_ref, w_ref, b_ref, o_ref, u_ref = refs
            s_ref = sh_ref = None

        i = pl.program_id(1)
        nblk = pl.num_programs(1)

        # ---- H-direction 2x bilinear upsample (W already upsampled in wrapper) ----
        x_cur = xw_ref[...]              # (ti, Wo, Cin): W-upsampled input rows [I0, I0+ti)
        x_top = xh_ref[0]                # row I0-1 (edge-clamped)
        x_bot = xh_ref[1]                # row I0+ti (edge-clamped)
        x_prev = jnp.concatenate([x_top[None], x_cur[:-1]], axis=0)
        x_next = jnp.concatenate([x_cur[1:], x_bot[None]], axis=0)
        u_even = 0.25 * x_prev + 0.75 * x_cur      # output rows 2j   (align_corners=False)
        u_odd = 0.75 * x_cur + 0.25 * x_next       # output rows 2j+1
        # Interleave even/odd rows: leading-dim merge => free reshape (no relayout).
        u_rows = jnp.concatenate([u_even[:, None], u_odd[:, None]], axis=1)
        u_rows = u_rows.reshape(tr, wo, cin)
        # Conv halo rows (global upsampled rows R0-1 and R0+tr).
        u_top = 0.75 * x_top + 0.25 * x_cur[0]
        u_bot = 0.25 * x_cur[ti - 1] + 0.75 * x_bot

        if has_skip:
            u_rows = u_rows + s_ref[...]
            u_top = u_top + sh_ref[0]
            u_bot = u_bot + sh_ref[1]

        # Halo rows outside the image are the conv's zero padding.
        u_top = jnp.where(i > 0, u_top, jnp.zeros_like(u_top))
        u_bot = jnp.where(i < nblk - 1, u_bot, jnp.zeros_like(u_bot))

        u_mid = jnp.concatenate([u_top[None], u_rows, u_bot[None]], axis=0)  # (tr+2, wo, cin)

        # ---- write the zero-W-padded conv input into VMEM scratch ----
        zcol = jnp.zeros((tr + 2, 1, cin), act_dtype)
        u_ref[:, 0:1, :] = zcol
        u_ref[:, wo + 1:wo + 2, :] = zcol
        u_ref[:, 1:wo + 1, :] = u_mid.astype(act_dtype)

        # ---- 3x3 conv: 3 MXU matmuls, M = tr*wo, K = 3*cin (dx taps folded), N = cout
        acc = jnp.zeros((tr * wo, cout), jnp.float32)
        for dy in range(3):
            rows = u_ref[dy:dy + tr, :, :]                          # (tr, wo+2, cin)
            slab = jnp.concatenate(
                [rows[:, 0:wo, :], rows[:, 1:wo + 1, :], rows[:, 2:wo + 2, :]],
                axis=-1)                                            # (tr, wo, 3*cin)
            slab = slab.reshape(tr * wo, 3 * cin)
            acc = acc + jnp.dot(slab, w_ref[dy],
                                preferred_element_type=jnp.float32)
        acc = acc + b_ref[...]                                      # f32 epilogue
        out = jnp.maximum(acc, 0.0).reshape(tr, wo, cout)
        o_ref[...] = out.astype(out_dtype)

    return kernel


def _pick_rows_per_block(h, wo, cin, cout, itemsize, budget_bytes=4 << 20):
    """Largest divisor of H whose per-block working set fits the budget."""
    best = 1
    for ti in range(1, h + 1):
        if h % ti:
            continue
        tr = 2 * ti
        blk = (
            itemsize * (ti * wo * cin + 2 * wo * cin          # xw block + halo
                        + tr * wo * cin + 2 * wo * cin        # skip block + halo
                        + (tr + 2) * (wo + 2) * cin           # scratch
                        + tr * wo * cout)                     # output block
            + 4 * (tr * wo * 3 * cin + tr * wo * cout)        # slab + f32 acc
        )
        if blk <= budget_bytes:
            best = ti
    return best


# --------------------------------------------------------------------------
# Wrapper: NCHW torch convention in/out, NHWC inside the kernel.
# --------------------------------------------------------------------------
def upsample_layer_forward(x, weight, bias, skip_connection=None, *,
                           scale_factor=2, rows_per_block=None):
    """x: (B, Cin, H, W); weight: (Cout, Cin, 3, 3); bias: (Cout,);
    skip_connection: optional (B, Cin, 2H, 2W). Returns (B, Cout, 2H, 2W)."""
    assert scale_factor == 2, "kernel specializes the module default scale_factor=2"
    B, C_in, H, W = x.shape
    C_out = weight.shape[0]
    Ho, Wo = 2 * H, 2 * W
    act_dtype = x.dtype
    itemsize = jnp.dtype(act_dtype).itemsize
    has_skip = skip_connection is not None

    # ---- W-direction bilinear upsample on the half-sized tensor (XLA side) ----
    x_nhwc = jnp.transpose(x, (0, 2, 3, 1))
    xl = jnp.concatenate([x_nhwc[:, :, :1], x_nhwc[:, :, :-1]], axis=2)
    xr = jnp.concatenate([x_nhwc[:, :, 1:], x_nhwc[:, :, -1:]], axis=2)
    even = 0.25 * xl + 0.75 * x_nhwc
    odd = 0.75 * x_nhwc + 0.25 * xr
    xw = jnp.stack([even, odd], axis=3).reshape(B, H, Wo, C_in)      # (B, H, Wo, Cin)

    # ---- row-block size ----
    if rows_per_block is None:
        rows_per_block = _pick_rows_per_block(H, Wo, C_in, C_out, itemsize)
    ti = int(rows_per_block)
    assert H % ti == 0, "rows_per_block must divide H"
    tr = 2 * ti
    nblk = H // ti

    # ---- tiny halo side-arrays (1 row above / below each block) ----
    blk = jnp.arange(nblk)
    top_idx = jnp.maximum(blk * ti - 1, 0)
    bot_idx = jnp.minimum((blk + 1) * ti, H - 1)
    xw_halo = jnp.stack([xw[:, top_idx], xw[:, bot_idx]], axis=2)    # (B, nblk, 2, Wo, Cin)

    operands = [xw, xw_halo]
    in_specs = [
        pl.BlockSpec((None, ti, Wo, C_in), lambda b, i: (b, i, 0, 0)),
        pl.BlockSpec((None, None, 2, Wo, C_in), lambda b, i: (b, i, 0, 0, 0)),
    ]
    skip_bytes = 0
    if has_skip:
        skip_nhwc = jnp.transpose(skip_connection, (0, 2, 3, 1)).astype(act_dtype)
        s_top_idx = jnp.maximum(blk * tr - 1, 0)
        s_bot_idx = jnp.minimum((blk + 1) * tr, Ho - 1)
        skip_halo = jnp.stack([skip_nhwc[:, s_top_idx], skip_nhwc[:, s_bot_idx]],
                              axis=2)                                # (B, nblk, 2, Wo, Cin)
        operands += [skip_nhwc, skip_halo]
        in_specs += [
            pl.BlockSpec((None, tr, Wo, C_in), lambda b, i: (b, i, 0, 0)),
            pl.BlockSpec((None, None, 2, Wo, C_in), lambda b, i: (b, i, 0, 0, 0)),
        ]
        skip_bytes = itemsize * (skip_nhwc.size + skip_halo.size)

    # ---- conv weights packed for the dx-folded contraction ----
    # w_packed[ky, kx*Cin + ci, co] = weight[co, ci, ky, kx]
    w_packed = jnp.transpose(weight, (2, 3, 1, 0)).reshape(3, 3 * C_in, C_out)
    w_packed = w_packed.astype(act_dtype)
    b2 = bias.reshape(1, C_out).astype(jnp.float32)
    operands += [w_packed, b2]
    in_specs += [
        pl.BlockSpec((3, 3 * C_in, C_out), lambda b, i: (0, 0, 0)),
        pl.BlockSpec((1, C_out), lambda b, i: (0, 0)),
    ]

    kernel = _make_fused_kernel(ti, Wo, C_in, C_out, has_skip, act_dtype, act_dtype)

    cost = pl.CostEstimate(
        flops=2 * B * Ho * Wo * 9 * C_in * C_out,
        transcendentals=0,
        bytes_accessed=(itemsize * (xw.size + xw_halo.size + B * Ho * Wo * C_out)
                        + skip_bytes + 4 * (w_packed.size + b2.size)),
    )

    out_nhwc = pl.pallas_call(
        kernel,
        out_shape=jax.ShapeDtypeStruct((B, Ho, Wo, C_out), act_dtype),
        grid_spec=pltpu.PrefetchScalarGridSpec(
            num_scalar_prefetch=0,
            grid=(B, nblk),
            in_specs=in_specs,
            out_specs=pl.BlockSpec((None, tr, Wo, C_out), lambda b, i: (b, i, 0, 0)),
            scratch_shapes=[pltpu.VMEM((tr + 2, Wo + 2, C_in), act_dtype)],
        ),
        compiler_params=pltpu.CompilerParams(
            dimension_semantics=("parallel", "parallel"),
            vmem_limit_bytes=32 * 1024 * 1024),
        cost_estimate=cost,
    )(*operands)

    return jnp.transpose(out_nhwc, (0, 3, 1, 2))


# --------------------------------------------------------------------------
# Plain-JAX reference (torch semantics) for the self-test.
# --------------------------------------------------------------------------
def _bilinear_up2x_ref(x_nhwc):
    B, H, W, C = x_nhwc.shape

    def src(out_len, in_len):
        i = jnp.arange(out_len, dtype=jnp.float32)
        s = jnp.maximum((i + 0.5) * (in_len / out_len) - 0.5, 0.0)
        i0 = jnp.floor(s).astype(jnp.int32)
        frac = s - i0.astype(jnp.float32)
        i1 = jnp.minimum(i0 + 1, in_len - 1)
        return i0, i1, frac

    r0, r1, rf = src(2 * H, H)
    c0, c1, cf = src(2 * W, W)
    xr = (x_nhwc[:, r0] * (1.0 - rf)[None, :, None, None]
          + x_nhwc[:, r1] * rf[None, :, None, None])
    out = (xr[:, :, c0] * (1.0 - cf)[None, None, :, None]
           + xr[:, :, c1] * cf[None, None, :, None])
    return out


def _reference_forward(x, weight, bias, skip):
    x_nhwc = jnp.transpose(x, (0, 2, 3, 1))
    up = _bilinear_up2x_ref(x_nhwc)
    if skip is not None:
        up = up + jnp.transpose(skip, (0, 2, 3, 1))
    w_hwio = jnp.transpose(weight, (2, 3, 1, 0))
    y = jax.lax.conv_general_dilated(
        up, w_hwio, window_strides=(1, 1), padding=((1, 1), (1, 1)),
        dimension_numbers=('NHWC', 'HWIO', 'NHWC'),
        precision=jax.lax.Precision.HIGHEST)
    y = jnp.maximum(y + bias[None, None, None, :], 0.0)
    return jnp.transpose(y, (0, 3, 1, 2))


if __name__ == "__main__":
    B, C_in, C_out, H, W = 2, 4, 8, 16, 16

    key = jax.random.PRNGKey(0)
    kx, ks, kw, kb = jax.random.split(key, 4)
    x = jax.random.normal(kx, (B, C_in, H, W), dtype=jnp.float32)
    skip = jax.random.normal(ks, (B, C_in, 2 * H, 2 * W), dtype=jnp.float32)
    weight = jax.random.normal(kw, (C_out, C_in, 3, 3), dtype=jnp.float32) * 0.1
    bias = jax.random.normal(kb, (C_out,), dtype=jnp.float32) * 0.1

    # Skip path with forced multi-row-block tiling (exercises the halo logic).
    out = upsample_layer_forward(x, weight, bias, skip_connection=skip,
                                 rows_per_block=4)
    jax.block_until_ready(out)
    assert out.shape == (B, C_out, 2 * H, 2 * W)
    ref = _reference_forward(x, weight, bias, skip)
    err = float(jnp.max(jnp.abs(out - ref)))
    assert jnp.allclose(out, ref, atol=1e-3, rtol=1e-3), err

    # No-skip path with auto block size (no zeros tensor is materialized or DMA'd).
    out2 = upsample_layer_forward(x, weight, bias, skip_connection=None)
    jax.block_until_ready(out2)
    ref2 = _reference_forward(x, weight, bias, None)
    err2 = float(jnp.max(jnp.abs(out2 - ref2)))
    assert jnp.allclose(out2, ref2, atol=1e-3, rtol=1e-3), err2

    print("KERNEL_OK")
</pallas_src>

<mosaic_0001>
module attributes {stable_mosaic.version = 11 : i64} {
  func.func @kernel(%arg0: i32, %arg1: i32, %arg2: memref<1x4x32x4xf32, #tpu.memory_space<vmem>>, %arg3: memref<1x1x2x32x4xf32, #tpu.memory_space<vmem>>, %arg4: memref<1x8x32x4xf32, #tpu.memory_space<vmem>>, %arg5: memref<1x1x2x32x4xf32, #tpu.memory_space<vmem>>, %arg6: memref<3x12x8xf32, #tpu.memory_space<vmem>>, %arg7: memref<1x8xf32, #tpu.memory_space<vmem>>, %arg8: memref<1x8x32x8xf32, #tpu.memory_space<vmem>>, %arg9: memref<10x34x4xf32, #tpu.memory_space<vmem>>) attributes {dimension_semantics = [#tpu.dimension_semantics<parallel>, #tpu.dimension_semantics<parallel>], iteration_bounds = array<i64: 2, 4>, scalar_prefetch = 0 : i64, scratch_operands = 1 : i64, tpu.core_type = #tpu.core_type<tc>, window_params = [{transform_indices = @transform_0, window_bounds = array<i64: 1, 4, 32, 4>}, {transform_indices = @transform_1, window_bounds = array<i64: 1, 1, 2, 32, 4>}, {transform_indices = @transform_2, window_bounds = array<i64: 1, 8, 32, 4>}, {transform_indices = @transform_3, window_bounds = array<i64: 1, 1, 2, 32, 4>}, {pipeline_mode = #tpu.pipeline_mode<synchronous>, transform_indices = @transform_4, window_bounds = array<i64: 3, 12, 8>}, {pipeline_mode = #tpu.pipeline_mode<synchronous>, transform_indices = @transform_5, window_bounds = array<i64: 1, 8>}, {transform_indices = @transform_6, window_bounds = array<i64: 1, 8, 32, 8>}]} {
    %c0 = arith.constant 0 : index
    %c0_0 = arith.constant 0 : index
    %c0_1 = arith.constant 0 : index
    %c0_2 = arith.constant 0 : index
    %0 = vector.load %arg2[%c0, %c0_0, %c0_1, %c0_2] : memref<1x4x32x4xf32, #tpu.memory_space<vmem>>, vector<1x4x32x4xf32>
    %1 = vector.shape_cast %0 : vector<1x4x32x4xf32> to vector<4x32x4xf32>
    %c0_3 = arith.constant 0 : index
    %c0_4 = arith.constant 0 : index
    %c0_5 = arith.constant 0 : index
    %c0_6 = arith.constant 0 : index
    %c0_7 = arith.constant 0 : index
    %2 = vector.load %arg3[%c0_3, %c0_4, %c0_5, %c0_6, %c0_7] : memref<1x1x2x32x4xf32, #tpu.memory_space<vmem>>, vector<1x1x1x32x4xf32>
    %3 = vector.shape_cast %2 : vector<1x1x1x32x4xf32> to vector<32x4xf32>
    %c0_8 = arith.constant 0 : index
    %c0_9 = arith.constant 0 : index
    %c1 = arith.constant 1 : index
    %c0_10 = arith.constant 0 : index
    %c0_11 = arith.constant 0 : index
    %4 = vector.load %arg3[%c0_8, %c0_9, %c1, %c0_10, %c0_11] : memref<1x1x2x32x4xf32, #tpu.memory_space<vmem>>, vector<1x1x1x32x4xf32>
    %5 = vector.shape_cast %4 : vector<1x1x1x32x4xf32> to vector<32x4xf32>
    %6 = vector.shape_cast %3 : vector<32x4xf32> to vector<1x32x4xf32>
    %7 = vector.extract_strided_slice %1 {offsets = [0, 0, 0], sizes = [3, 32, 4], strides = [1, 1, 1]} : vector<4x32x4xf32> to vector<3x32x4xf32>
    %8 = tpu.concatenate %6, %7 in 0 : vector<1x32x4xf32>, vector<3x32x4xf32> -> vector<4x32x4xf32>
    %9 = vector.extract_strided_slice %1 {offsets = [1, 0, 0], sizes = [3, 32, 4], strides = [1, 1, 1]} : vector<4x32x4xf32> to vector<3x32x4xf32>
    %10 = vector.shape_cast %5 : vector<32x4xf32> to vector<1x32x4xf32>
    %11 = tpu.concatenate %9, %10 in 0 : vector<3x32x4xf32>, vector<1x32x4xf32> -> vector<4x32x4xf32>
    %cst = arith.constant 2.500000e-01 : f32
    %12 = vector.broadcast %cst : f32 to vector<4x32x4xf32>
    %13 = arith.mulf %12, %8 : vector<4x32x4xf32>
    %cst_12 = arith.constant 7.500000e-01 : f32
    %14 = vector.broadcast %cst_12 : f32 to vector<4x32x4xf32>
    %15 = arith.mulf %14, %1 : vector<4x32x4xf32>
    %16 = arith.addf %13, %15 : vector<4x32x4xf32>
    %cst_13 = arith.constant 7.500000e-01 : f32
    %17 = vector.broadcast %cst_13 : f32 to vector<4x32x4xf32>
    %18 = arith.mulf %17, %1 : vector<4x32x4xf32>
    %cst_14 = arith.constant 2.500000e-01 : f32
    %19 = vector.broadcast %cst_14 : f32 to vector<4x32x4xf32>
    %20 = arith.mulf %19, %11 : vector<4x32x4xf32>
    %21 = arith.addf %18, %20 : vector<4x32x4xf32>
    %22 = vector.shape_cast %16 : vector<4x32x4xf32> to vector<4x1x32x4xf32>
    %23 = vector.shape_cast %21 : vector<4x32x4xf32> to vector<4x1x32x4xf32>
    %24 = tpu.concatenate %22, %23 in 1 : vector<4x1x32x4xf32>, vector<4x1x32x4xf32> -> vector<4x2x32x4xf32>
    %25 = vector.shape_cast %24 : vector<4x2x32x4xf32> to vector<8x32x4xf32>
    %cst_15 = arith.constant 7.500000e-01 : f32
    %26 = vector.broadcast %cst_15 : f32 to vector<32x4xf32>
    %27 = arith.mulf %26, %3 : vector<32x4xf32>
    %28 = vector.extract_strided_slice %1 {offsets = [0, 0, 0], sizes = [1, 32, 4], strides = [1, 1, 1]} : vector<4x32x4xf32> to vector<1x32x4xf32>
    %29 = vector.shape_cast %28 : vector<1x32x4xf32> to vector<32x4xf32>
    %cst_16 = arith.constant 2.500000e-01 : f32
    %30 = vector.broadcast %cst_16 : f32 to vector<32x4xf32>
    %31 = arith.mulf %30, %29 : vector<32x4xf32>
    %32 = arith.addf %27, %31 : vector<32x4xf32>
    %33 = vector.extract_strided_slice %1 {offsets = [3, 0, 0], sizes = [1, 32, 4], strides = [1, 1, 1]} : vector<4x32x4xf32> to vector<1x32x4xf32>
    %34 = vector.shape_cast %33 : vector<1x32x4xf32> to vector<32x4xf32>
    %cst_17 = arith.constant 2.500000e-01 : f32
    %35 = vector.broadcast %cst_17 : f32 to vector<32x4xf32>
    %36 = arith.mulf %35, %34 : vector<32x4xf32>
    %cst_18 = arith.constant 7.500000e-01 : f32
    %37 = vector.broadcast %cst_18 : f32 to vector<32x4xf32>
    %38 = arith.mulf %37, %5 : vector<32x4xf32>
    %39 = arith.addf %36, %38 : vector<32x4xf32>
    %c0_19 = arith.constant 0 : index
    %c0_20 = arith.constant 0 : index
    %c0_21 = arith.constant 0 : index
    %c0_22 = arith.constant 0 : index
    %40 = vector.load %arg4[%c0_19, %c0_20, %c0_21, %c0_22] : memref<1x8x32x4xf32, #tpu.memory_space<vmem>>, vector<1x8x32x4xf32>
    %41 = vector.shape_cast %40 : vector<1x8x32x4xf32> to vector<8x32x4xf32>
    %42 = arith.addf %25, %41 : vector<8x32x4xf32>
    %c0_23 = arith.constant 0 : index
    %c0_24 = arith.constant 0 : index
    %c0_25 = arith.constant 0 : index
    %c0_26 = arith.constant 0 : index
    %c0_27 = arith.constant 0 : index
    %43 = vector.load %arg5[%c0_23, %c0_24, %c0_25, %c0_26, %c0_27] : memref<1x1x2x32x4xf32, #tpu.memory_space<vmem>>, vector<1x1x1x32x4xf32>
    %44 = vector.shape_cast %43 : vector<1x1x1x32x4xf32> to vector<32x4xf32>
    %45 = arith.addf %32, %44 : vector<32x4xf32>
    %c0_28 = arith.constant 0 : index
    %c0_29 = arith.constant 0 : index
    %c1_30 = arith.constant 1 : index
    %c0_31 = arith.constant 0 : index
    %c0_32 = arith.constant 0 : index
    %46 = vector.load %arg5[%c0_28, %c0_29, %c1_30, %c0_31, %c0_32] : memref<1x1x2x32x4xf32, #tpu.memory_space<vmem>>, vector<1x1x1x32x4xf32>
    %47 = vector.shape_cast %46 : vector<1x1x1x32x4xf32> to vector<32x4xf32>
    %48 = arith.addf %39, %47 : vector<32x4xf32>
    %c0_i32 = arith.constant 0 : i32
    %49 = arith.cmpi sgt, %arg1, %c0_i32 : i32
    %cst_33 = arith.constant 0.000000e+00 : f32
    %50 = vector.broadcast %cst_33 : f32 to vector<32x4xf32>
    %51 = arith.select %49, %45, %50 : vector<32x4xf32>
    %c3_i32 = arith.constant 3 : i32
    %52 = arith.cmpi slt, %arg1, %c3_i32 : i32
    %cst_34 = arith.constant 0.000000e+00 : f32
    %53 = vector.broadcast %cst_34 : f32 to vector<32x4xf32>
    %54 = arith.select %52, %48, %53 : vector<32x4xf32>
    %55 = vector.shape_cast %51 : vector<32x4xf32> to vector<1x32x4xf32>
    %56 = vector.shape_cast %54 : vector<32x4xf32> to vector<1x32x4xf32>
    %57 = tpu.concatenate %55, %42, %56 in 0 : vector<1x32x4xf32>, vector<8x32x4xf32>, vector<1x32x4xf32> -> vector<10x32x4xf32>
    %cst_35 = arith.constant 0.000000e+00 : f32
    %58 = vector.broadcast %cst_35 : f32 to vector<10x1x4xf32>
    %c0_36 = arith.constant 0 : index
    %c0_37 = arith.constant 0 : index
    %c0_38 = arith.constant 0 : index
    %59 = vector.load %arg9[%c0_36, %c0_37, %c0_38] : memref<10x34x4xf32, #tpu.memory_space<vmem>>, vector<10x1x4xf32>
    tpu.vector_store %arg9[%c0_36, %c0_37, %c0_38], %58 {strides = array<i32>} : memref<10x34x4xf32, #tpu.memory_space<vmem>>, vector<10x1x4xf32>,
    %c0_39 = arith.constant 0 : index
    %c33 = arith.constant 33 : index
    %c0_40 = arith.constant 0 : index
    %60 = vector.load %arg9[%c0_39, %c33, %c0_40] : memref<10x34x4xf32, #tpu.memory_space<vmem>>, vector<10x1x4xf32>
    tpu.vector_store %arg9[%c0_39, %c33, %c0_40], %58 {strides = array<i32>} : memref<10x34x4xf32, #tpu.memory_space<vmem>>, vector<10x1x4xf32>,
    %c0_41 = arith.constant 0 : index
    %c1_42 = arith.constant 1 : index
    %c0_43 = arith.constant 0 : index
    %61 = vector.load %arg9[%c0_41, %c1_42, %c0_43] : memref<10x34x4xf32, #tpu.memory_space<vmem>>, vector<10x32x4xf32>
    tpu.vector_store %arg9[%c0_41, %c1_42, %c0_43], %57 {strides = array<i32>} : memref<10x34x4xf32, #tpu.memory_space<vmem>>, vector<10x32x4xf32>,
    %cst_44 = arith.constant 0.000000e+00 : f32
    %62 = vector.broadcast %cst_44 : f32 to vector<256x8xf32>
    %c0_45 = arith.constant 0 : index
    %c0_46 = arith.constant 0 : index
    %c0_47 = arith.constant 0 : index
    %63 = vector.load %arg9[%c0_45, %c0_46, %c0_47] : memref<10x34x4xf32, #tpu.memory_space<vmem>>, vector<8x34x4xf32>
    %64 = vector.extract_strided_slice %63 {offsets = [0, 0, 0], sizes = [8, 32, 4], strides = [1, 1, 1]} : vector<8x34x4xf32> to vector<8x32x4xf32>
    %65 = vector.extract_strided_slice %63 {offsets = [0, 1, 0], sizes = [8, 32, 4], strides = [1, 1, 1]} : vector<8x34x4xf32> to vector<8x32x4xf32>
    %66 = vector.extract_strided_slice %63 {offsets = [0, 2, 0], sizes = [8, 32, 4], strides = [1, 1, 1]} : vector<8x34x4xf32> to vector<8x32x4xf32>
    %67 = tpu.concatenate %64, %65, %66 in 2 : vector<8x32x4xf32>, vector<8x32x4xf32>, vector<8x32x4xf32> -> vector<8x32x12xf32>
    %68 = vector.shape_cast %67 : vector<8x32x12xf32> to vector<256x12xf32>
    %c0_48 = arith.constant 0 : index
    %c0_49 = arith.constant 0 : index
    %c0_50 = arith.constant 0 : index
    %69 = vector.load %arg6[%c0_48, %c0_49, %c0_50] : memref<3x12x8xf32, #tpu.memory_space<vmem>>, vector<1x12x8xf32>
    %70 = vector.shape_cast %69 : vector<1x12x8xf32> to vector<12x8xf32>
    %cst_51 = arith.constant dense<0.000000e+00> : vector<256x8xf32>
    %71 = tpu.matmul %68, %70, %cst_51 {dimension_numbers = #tpu.dot_dimension_numbers<[1], [0], [0], [1], [0, 0, 1, 1], [], []>} : vector<256x12xf32>, vector<12x8xf32>, vector<256x8xf32> -> vector<256x8xf32>
    %72 = arith.addf %62, %71 : vector<256x8xf32>
    %c1_52 = arith.constant 1 : index
    %c0_53 = arith.constant 0 : index
    %c0_54 = arith.constant 0 : index
    %73 = vector.load %arg9[%c1_52, %c0_53, %c0_54] : memref<10x34x4xf32, #tpu.memory_space<vmem>>, vector<8x34x4xf32>
    %74 = vector.extract_strided_slice %73 {offsets = [0, 0, 0], sizes = [8, 32, 4], strides = [1, 1, 1]} : vector<8x34x4xf32> to vector<8x32x4xf32>
    %75 = vector.extract_strided_slice %73 {offsets = [0, 1, 0], sizes = [8, 32, 4], strides = [1, 1, 1]} : vector<8x34x4xf32> to vector<8x32x4xf32>
    %76 = vector.extract_strided_slice %73 {offsets = [0, 2, 0], sizes = [8, 32, 4], strides = [1, 1, 1]} : vector<8x34x4xf32> to vector<8x32x4xf32>
    %77 = tpu.concatenate %74, %75, %76 in 2 : vector<8x32x4xf32>, vector<8x32x4xf32>, vector<8x32x4xf32> -> vector<8x32x12xf32>
    %78 = vector.shape_cast %77 : vector<8x32x12xf32> to vector<256x12xf32>
    %c1_55 = arith.constant 1 : index
    %c0_56 = arith.constant 0 : index
    %c0_57 = arith.constant 0 : index
    %79 = vector.load %arg6[%c1_55, %c0_56, %c0_57] : memref<3x12x8xf32, #tpu.memory_space<vmem>>, vector<1x12x8xf32>
    %80 = vector.shape_cast %79 : vector<1x12x8xf32> to vector<12x8xf32>
    %cst_58 = arith.constant dense<0.000000e+00> : vector<256x8xf32>
    %81 = tpu.matmul %78, %80, %cst_58 {dimension_numbers = #tpu.dot_dimension_numbers<[1], [0], [0], [1], [0, 0, 1, 1], [], []>} : vector<256x12xf32>, vector<12x8xf32>, vector<256x8xf32> -> vector<256x8xf32>
    %82 = arith.addf %72, %81 : vector<256x8xf32>
    %c2 = arith.constant 2 : index
    %c0_59 = arith.constant 0 : index
    %c0_60 = arith.constant 0 : index
    %83 = vector.load %arg9[%c2, %c0_59, %c0_60] : memref<10x34x4xf32, #tpu.memory_space<vmem>>, vector<8x34x4xf32>
    %84 = vector.extract_strided_slice %83 {offsets = [0, 0, 0], sizes = [8, 32, 4], strides = [1, 1, 1]} : vector<8x34x4xf32> to vector<8x32x4xf32>
    %85 = vector.extract_strided_slice %83 {offsets = [0, 1, 0], sizes = [8, 32, 4], strides = [1, 1, 1]} : vector<8x34x4xf32> to vector<8x32x4xf32>
    %86 = vector.extract_strided_slice %83 {offsets = [0, 2, 0], sizes = [8, 32, 4], strides = [1, 1, 1]} : vector<8x34x4xf32> to vector<8x32x4xf32>
    %87 = tpu.concatenate %84, %85, %86 in 2 : vector<8x32x4xf32>, vector<8x32x4xf32>, vector<8x32x4xf32> -> vector<8x32x12xf32>
    %88 = vector.shape_cast %87 : vector<8x32x12xf32> to vector<256x12xf32>
    %c2_61 = arith.constant 2 : index
    %c0_62 = arith.constant 0 : index
    %c0_63 = arith.constant 0 : index
    %89 = vector.load %arg6[%c2_61, %c0_62, %c0_63] : memref<3x12x8xf32, #tpu.memory_space<vmem>>, vector<1x12x8xf32>
    %90 = vector.shape_cast %89 : vector<1x12x8xf32> to vector<12x8xf32>
    %cst_64 = arith.constant dense<0.000000e+00> : vector<256x8xf32>
    %91 = tpu.matmul %88, %90, %cst_64 {dimension_numbers = #tpu.dot_dimension_numbers<[1], [0], [0], [1], [0, 0, 1, 1], [], []>} : vector<256x12xf32>, vector<12x8xf32>, vector<256x8xf32> -> vector<256x8xf32>
    %92 = arith.addf %82, %91 : vector<256x8xf32>
    %c0_65 = arith.constant 0 : index
    %c0_66 = arith.constant 0 : index
    %93 = vector.load %arg7[%c0_65, %c0_66] : memref<1x8xf32, #tpu.memory_space<vmem>>, vector<1x8xf32>
    %94 = vector.broadcast %93 : vector<1x8xf32> to vector<256x8xf32>
    %95 = arith.addf %92, %94 : vector<256x8xf32>
    %cst_67 = arith.constant 0.000000e+00 : f32
    %96 = vector.broadcast %cst_67 : f32 to vector<256x8xf32>
    %97 = arith.maximumf %95, %96 : vector<256x8xf32>
    %98 = vector.shape_cast %97 : vector<256x8xf32> to vector<8x32x8xf32>
    %c0_68 = arith.constant 0 : index
    %c0_69 = arith.constant 0 : index
    %c0_70 = arith.constant 0 : index
    %c0_71 = arith.constant 0 : index
    %99 = vector.load %arg8[%c0_68, %c0_69, %c0_70, %c0_71] : memref<1x8x32x8xf32, #tpu.memory_space<vmem>>, vector<1x8x32x8xf32>
    %100 = vector.shape_cast %99 : vector<1x8x32x8xf32> to vector<8x32x8xf32>
    %101 = vector.shape_cast %98 : vector<8x32x8xf32> to vector<1x8x32x8xf32>
    tpu.vector_store %arg8[%c0_68, %c0_69, %c0_70, %c0_71], %101 {strides = array<i32>} : memref<1x8x32x8xf32, #tpu.memory_space<vmem>>, vector<1x8x32x8xf32>,
    return
  }
  func.func @transform_0(%arg0: i32, %arg1: i32) -> (i32, i32, i32, i32) {
    %c0_i32 = arith.constant 0 : i32
    %c0_i32_0 = arith.constant 0 : i32
    %c0_i32_1 = arith.constant 0 : i32
    return %arg0, %arg1, %c0_i32, %c0_i32_0 : i32, i32, i32, i32
  }
  func.func @transform_1(%arg0: i32, %arg1: i32) -> (i32, i32, i32, i32, i32) {
    %c0_i32 = arith.constant 0 : i32
    %c0_i32_0 = arith.constant 0 : i32
    %c0_i32_1 = arith.constant 0 : i32
    %c0_i32_2 = arith.constant 0 : i32
    return %arg0, %arg1, %c0_i32, %c0_i32_0, %c0_i32_1 : i32, i32, i32, i32, i32
  }
  func.func @transform_2(%arg0: i32, %arg1: i32) -> (i32, i32, i32, i32) {
    %c0_i32 = arith.constant 0 : i32
    %c0_i32_0 = arith.constant 0 : i32
    %c0_i32_1 = arith.constant 0 : i32
    return %arg0, %arg1, %c0_i32, %c0_i32_0 : i32, i32, i32, i32
  }
  func.func @transform_3(%arg0: i32, %arg1: i32) -> (i32, i32, i32, i32, i32) {
    %c0_i32 = arith.constant 0 : i32
    %c0_i32_0 = arith.constant 0 : i32
    %c0_i32_1 = arith.constant 0 : i32
    %c0_i32_2 = arith.constant 0 : i32
    return %arg0, %arg1, %c0_i32, %c0_i32_0, %c0_i32_1 : i32, i32, i32, i32, i32
  }
  func.func @transform_4(%arg0: i32, %arg1: i32) -> (i32, i32, i32) {
    %c0_i32 = arith.constant 0 : i32
    %c0_i32_0 = arith.constant 0 : i32
    %c0_i32_1 = arith.constant 0 : i32
    %c0_i32_2 = arith.constant 0 : i32
    return %c0_i32, %c0_i32_0, %c0_i32_1 : i32, i32, i32
  }
  func.func @transform_5(%arg0: i32, %arg1: i32) -> (i32, i32) {
    %c0_i32 = arith.constant 0 : i32
    %c0_i32_0 = arith.constant 0 : i32
    %c0_i32_1 = arith.constant 0 : i32
    return %c0_i32, %c0_i32_0 : i32, i32
  }
  func.func @transform_6(%arg0: i32, %arg1: i32) -> (i32, i32, i32, i32) {
    %c0_i32 = arith.constant 0 : i32
    %c0_i32_0 = arith.constant 0 : i32
    %c0_i32_1 = arith.constant 0 : i32
    return %arg0, %arg1, %c0_i32, %c0_i32_0 : i32, i32, i32, i32
  }
}

</mosaic_0001>

<bundles_post_ra>
// kernel: tpu_custom_call.1
= control target key start
LH: loop header
LB: loop body
LE: loop exit
PB: predicated region body
PF: predicated region fallthrough
CT: control target
= control target key end

     0   :  { %s4029_s21 = smov 0   ;;  %s4031_s22 = smov 0   ;;  %s5811_s0 = inlined_call_operand.vmem [shape: f32[2,16,32,4], index: 0, kind: input, shape index: {}]   ;;  %s5812_s1 = inlined_call_operand.vmem [shape: f32[2,4,2,32,4], index: 1, kind: input, shape index: {}]   ;;  %s5813_s2 = inlined_call_operand.vmem [shape: f32[2,32,32,4], index: 2, kind: input, shape index: {}]   ;;  %s5814_s3 = inlined_call_operand.vmem [shape: f32[2,4,2,32,4], index: 3, kind: input, shape index: {}]   ;;  %s5815_s4 = inlined_call_operand.vmem [shape: f32[3,12,8], index: 4, kind: input, shape index: {}]   ;;  %s5816_s5 = inlined_call_operand.vmem [shape: f32[1,8], index: 5, kind: input, shape index: {}]   ;;  %s5817_s6 = inlined_call_operand.vmem [shape: f32[2,32,32,8], index: 6, kind: output, shape index: {}]  }
   0x1   :  { %s4033_s23 = smov 0   ;;  %s4035_s24 = smov 0  }
   0x2   :  { %s4037_s25 = smov 0  }
   0x3 LB: > { %s25_s26 = sadd.s32 1, %s3980_s23  ;;  %s28_s27 = sadd.s32 1, %s3984_s24  ;;  %s3988_s25 = sphi %s4037_s25, %s16_s25   ;;  %s3984_s24 = sphi %s4035_s24, %s5867_s24   ;;  %s3980_s23 = sphi %s4033_s23, %s5866_s23   ;;  %s3976_s22 = sphi %s4031_s22, %s5865_s22   ;;  %s3972_s21 = sphi %s4029_s21, %s5864_s21  }
   0x4   : > { %p26_p0 = scmp.ge.s32.totalorder %s25_s26, 4  ;;  %p3403_p1 = scmp.ge.s32.totalorder %s3988_s25, 1 }
   0x5   : > { %p284_p2 = scmp.lt.s32.totalorder %s3988_s25, 9 }
   0x6   : > { %s5869_s26 = smov (%p26_p0, %s25_s26), 0  ;;  %s5871_s27 = smov (!%p26_p0, %s28_s27), %s3984_s24 }
   0x7   : > { %p285_p3 = pnand %p3403_p1, %p284_p2  ;;  %p30_p4 = scmp.ge.s32.totalorder %s5871_s27, 2 }
   0x9   : > { %s5873_s27 = smov (%p30_p4, %s5871_s27), 0  ;;  %288 = sbr.rel (%p285_p3) target bundleno = 766 (0x2fe), region = 44 }
  0x10   : > { %s3404_s28 = sshll.u32 %s3972_s21, 2  ;;  %p353_p5 = scmp.lt.s32.totalorder %s3976_s22, 1  ;;  %vm613_vm0 = vcmask 24576   ;;  %v3990_v0 = vmov 0.0   ;;  %vm634_vm1 = vcmask 31744   ;;  %vm1741_vm3 = vcmask 1043456  }
  0x11   : > { %p4065_p6 = scmp.lt.s32.totalorder %s3404_s28, 15  ;;  %615 = vst.msk [vmem:[#allocation2 + $0x28] sm:$0x1] %vm613_vm0, %v3990_v0  ;;  %614 = vst.msk [vmem:[#allocation2] sm:$0x1] %vm613_vm0, %v3990_v0  ;;  %p365_p7 = scmp.lt.s32.totalorder %s3972_s21, 3 }
  0x12   : > { %616 = vst.msk [vmem:[#allocation2 + $0x50] sm:$0x1] %vm613_vm0, %v3990_v0  ;;  %617 = vst.msk [vmem:[#allocation2 + $0x78] sm:$0x1] %vm613_vm0, %v3990_v0  ;;  %s5875_s22 = smov (!%p353_p5, %s3976_s22), 1  ;;  %s3411_s8 = sshll.u32 %s3972_s21, 3 }
  0x13   : > { %618 = vst.msk [vmem:[#allocation2 + $0xa0] sm:$0x1] %vm613_vm0, %v3990_v0  ;;  %619 = vst.msk [vmem:[#allocation2 + $0xc8] sm:$0x1] %vm613_vm0, %v3990_v0  ;;  %s5877_s28 = smov (!%p4065_p6, %s3404_s28), 15  ;;  %s3406_s30 = sshll.u32 %s5875_s22, 6 }
  0x14   : > { %620 = vst.msk [vmem:[#allocation2 + $0xf0] sm:$0x1] %vm613_vm0, %v3990_v0  ;;  %621 = vst.msk [vmem:[#allocation2 + $0x118] sm:$0x1] %vm613_vm0, %v3990_v0  ;;  %s3405_s7 = sshll.u32 %s5877_s28, 2  ;;  %p375_p8 = scmp.lt.s32.totalorder %s3411_s8, 31 }
  0x15   : > { %622 = vst.msk [vmem:[#allocation2 + $0x140] sm:$0x1] %vm613_vm0, %v3990_v0  ;;  %623 = vst.msk [vmem:[#allocation2 + $0x168] sm:$0x1] %vm613_vm0, %v3990_v0  ;;  %s359_s9 = sadd.s32 %s3406_s30, %s3405_s7  ;;  %s3409_s11 = sshll.u32 %s5875_s22, 5  ;;  %vm755_vm4 = vcmask 1046528  }
  0x16   : > { %624 = vst.msk [vmem:[#allocation2 + $0x21] sm:$0x1] %vm613_vm0, %v3990_v0  ;;  %625 = vst.msk [vmem:[#allocation2 + $0x49] sm:$0x1] %vm613_vm0, %v3990_v0  ;;  %s3407_s10 = sshll.u32 %s359_s9, 3  ;;  %s3413_s15 = sshll.u32 %s5875_s22, 7 }
  0x17   : > { %626 = vst.msk [vmem:[#allocation2 + $0x71] sm:$0x1] %vm613_vm0, %v3990_v0  ;;  %627 = vst.msk [vmem:[#allocation2 + $0x99] sm:$0x1] %vm613_vm0, %v3990_v0  ;;  %s4103_s14 = scalar_lea.vmem %s5811_s0, %s3407_s10  ;;  %s5879_s8 = smov (!%p375_p8, %s3411_s8), 31  ;;  %vm3991_vm5 = vmmov 1  }
  0x18   : > { %628 = vst.msk [vmem:[#allocation2 + $0xc1] sm:$0x1] %vm613_vm0, %v3990_v0  ;;  %629 = vst.msk [vmem:[#allocation2 + $0xe9] sm:$0x1] %vm613_vm0, %v3990_v0  ;;  %s366_s16 = scalar_select %p365_p7, %s3972_s21, 3  ;;  %v403_v1 = vld [vmem:[%s4103_s14] sm:$0xff] }
  0x19   : > { %630 = vst.msk [vmem:[#allocation2 + $0x111] sm:$0x1] %vm613_vm0, %v3990_v0  ;;  %631 = vst.msk [vmem:[#allocation2 + $0x139] sm:$0x1] %vm613_vm0, %v3990_v0  ;;  %v404_v2 = vld [vmem:[%s4103_s14 + $0x8] sm:$0xff]  ;;  %v405_v3 = vld [vmem:[%s4103_s14 + $0x10] sm:$0xff] }
  0x1a   : > { %632 = vst.msk [vmem:[#allocation2 + $0x161] sm:$0x1] %vm613_vm0, %v3990_v0  ;;  %633 = vst.msk [vmem:[#allocation2 + $0x189] sm:$0x1] %vm613_vm0, %v3990_v0  ;;  %v433_v4 = vmul.f32 0.25, %v404_v2  ;;  %v4112_v5 = vmul.f32 0.25, %v405_v3 }
  0x1b   : > { %v406_v6 = vld [vmem:[%s4103_s14 + $0x18] sm:$0xff]  ;;  %s3408_s17 = sshll.u32 %s366_s16, 3  ;;  %v444_v7 = vmul.f32 0.75, %v403_v1  ;;  %v445_v8 = vmul.f32 0.75, %v404_v2  ;;  %v446_v9 = vmul.f32 0.75, %v405_v3  ;;  %v432_v10 = vmul.f32 0.25, %v403_v1  ;;  %vm4262_vm6 = vmpackc.low %vm1741_vm3, %vm3991_vm5 }
  0x1c   : > { %s4115_s18 = sadd.s32 %s3409_s11, %s3408_s17  ;;  %s3412_s19 = sshll.u32 %s5879_s8, 2  ;;  %v447_v11 = vmul.f32 0.75, %v406_v6  ;;  %v4117_v12 = vmul.f32 0.25, %v406_v6  ;;  %v407_v13 = vld [vmem:[%s4103_s14 + $0x20] sm:$0xff]  ;;  %v408_v14 = vld [vmem:[%s4103_s14 + $0x28] sm:$0xff]  ;;  %v409_v15 = vld [vmem:[%s4103_s14 + $0x30] sm:$0xff] }
  0x1d   : > { %s3410_s20 = sshll.u32 %s4115_s18, 3  ;;  %s4123_s22 = sadd.s32 %s3413_s15, %s3412_s19  ;;  %v4125_v16 = vmul.f32 0.25, %v407_v13  ;;  %v4127_v17 = vmul.f32 0.25, %v408_v14  ;;  %v4129_v18 = vmul.f32 0.25, %v409_v15  ;;  %v410_v19 = vld [vmem:[%s4103_s14 + $0x38] sm:$0xff]  ;;  %v4132_v20 = vmul.f32 0.75, %v407_v13 }
  0x1e   : > { %s4137_s30 = scalar_lea.vmem %s5812_s1, %s3410_s20  ;;  %s3414_s7 = sshll.u32 %s4123_s22, 3  ;;  %v4140_v21 = vmul.f32 0.25, %v410_v19  ;;  %v4142_v22 = vmul.f32 0.75, %v408_v14  ;;  %v4144_v23 = vmul.f32 0.75, %v409_v15  ;;  %v4146_v24 = vmul.f32 0.75, %v410_v19 }
  0x1f   : > { %s4153_s10 = scalar_lea.vmem %s5813_s2, %s3414_s7  ;;  %v419_v25 = vld [vmem:[%s4137_s30] sm:$0xff]  ;;  %v420_v26 = vld [vmem:[%s4137_s30 + $0x8] sm:$0xff]  ;;  %v421_v27 = vld [vmem:[%s4137_s30 + $0x10] sm:$0xff]  ;;  %v484_v28 = vadd.f32 %v444_v7, %v4125_v16  ;;  %v485_v29 = vadd.f32 %v445_v8, %v4127_v17  ;;  %v4161_v30 = vadd.f32 %v446_v9, %v4129_v18  ;;  %v4164_v31 = vadd.f32 %v4132_v20, %v432_v10  ;;  %s4170_s13 = scalar_lea.vmem %s5814_s3, %s3410_s20 }
  0x20   : > { %v428_v32 = vmul.f32 0.25, %v419_v25  ;;  %v429_v33 = vmul.f32 0.25, %v420_v26  ;;  %v430_v34 = vmul.f32 0.25, %v421_v27  ;;  %v500_v35 = vmul.f32 0.75, %v419_v25  ;;  %v516_v36 = vld [vmem:[%s4153_s10] sm:$0xff]  ;;  %v517_v39 = vld [vmem:[%s4153_s10 + $0x8] sm:$0xff]  ;;  %s5655_s18 = scalar_lea.vmem %s5817_s6, %s3414_s7 }
  0x21   : > { %v501_v37 = vmul.f32 0.75, %v420_v26  ;;  %v502_v38 = vmul.f32 0.75, %v421_v27  ;;  %v518_v40 = vld [vmem:[%s4153_s10 + $0x10] sm:$0xff]  ;;  %v422_v41 = vld [vmem:[%s4137_s30 + $0x18] sm:$0xff]  ;;  %p597_p9 = scmp.gt.s32.totalorder %s3972_s21, 0  ;;  %v487_v42 = vadd.f32 %v447_v11, %v4140_v21  ;;  %v465_v43 = vadd.f32 %v4142_v22, %v433_v4  ;;  %v581_v48 = vld [vmem:[%s4170_s13 + $0x8] sm:$0xff] }
  0x22   : > { %v460_v44 = vadd.f32 %v444_v7, %v428_v32  ;;  %v461_v45 = vadd.f32 %v445_v8, %v429_v33  ;;  %v462_v46 = vadd.f32 %v446_v9, %v430_v34  ;;  %v431_v47 = vmul.f32 0.25, %v422_v41  ;;  %v582_v49 = vld [vmem:[%s4170_s13 + $0x10] sm:$0xff]  ;;  %v519_v50 = vld [vmem:[%s4153_s10 + $0x18] sm:$0xff]  ;;  %v580_v55 = vld [vmem:[%s4170_s13] sm:$0xff]  ;;  %s3992_s20 = smov 4   ;;  %s3993_s28 = smov 8  }
  0x23   : > { %v503_v51 = vmul.f32 0.75, %v422_v41  ;;  %v505_v52 = vadd.f32 %v501_v37, %v433_v4  ;;  %v506_v53 = vadd.f32 %v502_v38, %v4112_v5  ;;  %s598_s15 = scalar_select %p597_p9, 1, 0  ;;  %v504_v54 = vadd.f32 %v500_v35, %v432_v10  ;;  %v520_v56 = vld [vmem:[%s4153_s10 + $0x20] sm:$0xff]  ;;  %v583_v61 = vld [vmem:[%s4170_s13 + $0x18] sm:$0xff]  ;;  %v521_v62 = vld [vmem:[%s4153_s10 + $0x28] sm:$0xff] }
  0x24   : > { %v548_v57 = vadd.f32 %v516_v36, %v460_v44  ;;  %v549_v58 = vadd.f32 %v517_v39, %v461_v45  ;;  %v550_v59 = vadd.f32 %v518_v40, %v462_v46  ;;  %v463_v60 = vadd.f32 %v447_v11, %v431_v47  ;;  %v522_v3 = vld [vmem:[%s4153_s10 + $0x30] sm:$0xff]  ;;  %v523_v4 = vld [vmem:[%s4153_s10 + $0x38] sm:$0xff]  ;;  %v524_v6 = vld [vmem:[%s4153_s10 + $0x40] sm:$0xff] }
  0x25   : > { %v507_v63 = vadd.f32 %v503_v51, %v4117_v12  ;;  %v585_v0 = vadd.f32 %v581_v48, %v505_v52  ;;  %v586_v1 = vadd.f32 %v582_v49, %v506_v53  ;;  %v599_v2 = vstv %s598_s15  ;;  %v525_v11 = vld [vmem:[%s4153_s10 + $0x48] sm:$0xff]  ;;  %v526_v25 = vld [vmem:[%s4153_s10 + $0x50] sm:$0xff]  ;;  %v4204_v26 = vld [vmem:[%s4103_s14 + $0x40] sm:$0xff]  ;;  %s606_s15 = scalar_select %p365_p7, 1, 0 }
  0x26   : > { %639 = vst.msk [vmem:[#allocation2 + $0x29] sm:$0xff] %vm634_vm1, %v548_v57  ;;  %640 = vst.msk [vmem:[#allocation2 + $0x31] sm:$0xff] %vm634_vm1, %v549_v58  ;;  %v551_v7 = vadd.f32 %v519_v50, %v463_v60  ;;  %vm4193_vm2 = vcmp.eq.s32.totalorder %v599_v2, 1  ;;  %v584_v9 = vadd.f32 %v580_v55, %v504_v54  ;;  %v552_v10 = vadd.f32 %v520_v56, %v484_v28  ;;  %v4207_v27 = vld [vmem:[%s4103_s14 + $0x48] sm:$0xff]  ;;  %v527_v34 = vld [vmem:[%s4153_s10 + $0x58] sm:$0xff] }
  0x27   : > { %641 = vst.msk [vmem:[#allocation2 + $0x39] sm:$0xff] %vm634_vm1, %v550_v59  ;;  %v587_v13 = vadd.f32 %v583_v61, %v507_v63  ;;  %v602_v14 = vsel %vm4193_vm2, %v585_v0, 0.0  ;;  %v603_v15 = vsel %vm4193_vm2, %v586_v1, 0.0  ;;  %v553_v19 = vadd.f32 %v521_v62, %v485_v29  ;;  %v3430_v35 = vld [vmem:[%s5815_s4 + $0x10] sm:$0xff]  ;;  %v3431_v36 = vld [vmem:[%s5815_s4 + $0x18] sm:$0xf] }
  0x28   : > { %642 = vst.msk [vmem:[#allocation2 + $0x41] sm:$0xff] %vm634_vm1, %v551_v7  ;;  %636 = vst.msk [vmem:[#allocation2 + $0x9] sm:$0xff] %vm634_vm1, %v602_v14  ;;  %v601_v28 = vsel %vm4193_vm2, %v584_v9, 0.0  ;;  %v554_v32 = vadd.f32 %v522_v3, %v4161_v30  ;;  %v555_v33 = vadd.f32 %v523_v4, %v487_v42  ;;  %v556_v29 = vadd.f32 %v524_v6, %v4164_v31  ;;  %v528_v44 = vld [vmem:[%s4153_s10 + $0x60] sm:$0xff]  ;;  %v529_v45 = vld [vmem:[%s4153_s10 + $0x68] sm:$0xff] }
  0x29   : > { %637 = vst.msk [vmem:[#allocation2 + $0x11] sm:$0xff] %vm634_vm1, %v603_v15  ;;  %643 = vst.msk [vmem:[#allocation2 + $0x51] sm:$0xff] %vm634_vm1, %v552_v10  ;;  %v604_v37 = vsel %vm4193_vm2, %v587_v13, 0.0  ;;  %v557_v30 = vadd.f32 %v525_v11, %v465_v43  ;;  %v466_v31 = vadd.f32 %v4144_v23, %v4112_v5  ;;  %v467_v38 = vadd.f32 %v4146_v24, %v4117_v12  ;;  %v413_v2 = vld [vmem:[%s4103_s14 + $0x50] sm:$0xff]  ;;  %v414_v3 = vld [vmem:[%s4103_s14 + $0x58] sm:$0xff] }
  0x2a   : > { %635 = vst.msk [vmem:[#allocation2 + $0x1] sm:$0xff] %vm634_vm1, %v601_v28  ;;  %644 = vst.msk [vmem:[#allocation2 + $0x59] sm:$0xff] %vm634_vm1, %v553_v19  ;;  %v4237_v39 = vmul.f32 0.25, %v4204_v26  ;;  %v4240_v40 = vmul.f32 0.25, %v4207_v27  ;;  %v3794_v12 = vpack.c.bf16 %v3431_v36, %v3430_v35  ;;  %vm924_vm7 = vcmask 1045504   ;;  %v530_v35 = vld [vmem:[%s4153_s10 + $0x70] sm:$0xff] }
  0x2b   : > { %638 = vst.msk [vmem:[#allocation2 + $0x19] sm:$0xff] %vm634_vm1, %v604_v37  ;;  %645 = vst.msk [vmem:[#allocation2 + $0x61] sm:$0xff] %vm634_vm1, %v554_v32  ;;  %v558_v5 = vadd.f32 %v526_v25, %v466_v31  ;;  %v559_v41 = vadd.f32 %v527_v34, %v467_v38  ;;  %v4323_v14 = vmul.f32 0.25, %v413_v2  ;;  %v4325_v15 = vmul.f32 0.25, %v414_v3  ;;  %v531_v36 = vld [vmem:[%s4153_s10 + $0x78] sm:$0xff] }
  0x2c   : > { %646 = vst.msk [vmem:[#allocation2 + $0x69] sm:$0xff] %vm634_vm1, %v555_v33  ;;  %647 = vst.msk [vmem:[#allocation2 + $0x79] sm:$0xff] %vm634_vm1, %v556_v29  ;;  %v488_v42 = vadd.f32 %v4132_v20, %v4237_v39  ;;  %v489_v43 = vadd.f32 %v4142_v22, %v4240_v40  ;;  %3796 = vmatprep.subr.msk.bf16.mxu1 %vm4262_vm6, %v3794_v12  ;;  %vm1125_vm8 = vcmask 64512   ;;  %vm1644_vm9 = vcmask 97280  }
  0x2d   : > { %648 = vst.msk [vmem:[#allocation2 + $0x81] sm:$0xff] %vm634_vm1, %v557_v30  ;;  %v4249_v46 = vld [vmem:[#allocation2 + $0x30] sm:$0xff]  ;;  %v4253_v48 = vld [vmem:[#allocation2 + $0x28] sm:$0xff]  ;;  %649 = vst.msk [vmem:[#allocation2 + $0x89] sm:$0xff] %vm634_vm1, %v558_v5  ;;  %3799 = vmatpush3.bf16.msk.msra.mxu1 %vm4262_vm6, %v3794_v12  ;;  %v490_v29 = vadd.f32 %v4144_v23, %v4323_v14  ;;  %v491_v34 = vadd.f32 %v4146_v24, %v4325_v15 }
  0x2e   : > { %v4251_v47 = vld [vmem:[#allocation2 + $0x38] sm:$0xff]  ;;  %650 = vst.msk [vmem:[#allocation2 + $0x91] sm:$0xff] %vm634_vm1, %v559_v41  ;;  %v766_v49 = vrot.slane %v4249_v46, 1  ;;  %v765_v50 = vrot.slane %v4253_v48, 1  ;;  %v1409_v22 = vrot.slane %v4253_v48, 2  ;;  %v1410_v52 = vrot.slane %v4249_v46, 2 }
  0x2f   : > { %v768_v20 = vrot.slane %v4251_v47, 1  ;;  %v560_v53 = vadd.f32 %v528_v44, %v488_v42  ;;  %v561_v54 = vadd.f32 %v529_v45, %v489_v43  ;;  %v1412_v58 = vrot.slane %v4251_v47, 2  ;;  %v4281_v59 = vld [vmem:[#allocation2 + $0x40] sm:$0xff]  ;;  %v4299_v1 = vld [vmem:[#allocation2 + $0x48] sm:$0x3] }
  0x30   : > { %v767_v56 = vsel %vm755_vm4, %v765_v50, %v766_v49  ;;  %v4278_v57 = vsel %vm924_vm7, %v1409_v22, %v1410_v52  ;;  %v4290_v61 = vrot.slane %v4281_v59, 2  ;;  %v4293_v62 = vrot.slane %v4281_v59, 1  ;;  %v4295_v63 = vld [vmem:[#allocation2 + $0x10] sm:$0xff]  ;;  %v1158_v23 = vld [vmem:[%s5815_s4] sm:$0xff]  ;;  %v1159_v24 = vld [vmem:[%s5815_s4 + $0x8] sm:$0xf] }
  0x31   : > { %v769_v55 = vsel %vm755_vm4, %v766_v49, %v768_v20  ;;  %836 = vrot.lane.b32.xlu0 %v767_v56, %s3992_s20  ;;  %651 = vst.msk [vmem:[#allocation2 + $0xa1] sm:$0xff] %vm634_vm1, %v560_v53  ;;  %652 = vst.msk [vmem:[#allocation2 + $0xa9] sm:$0xff] %vm634_vm1, %v561_v54  ;;  %v4287_v60 = vsel %vm924_vm7, %v1410_v52, %v1412_v58  ;;  %v759_v4 = vrot.slane %v4295_v63, 1  ;;  %v1248_v9 = vrot.slane %v4299_v1, 1  ;;  %v4319_v11 = vld [vmem:[#allocation2] sm:$0xff]  ;;  %v4321_v13 = vld [vmem:[#allocation2 + $0x8] sm:$0xff] }
  0x32   : > { %838 = vrot.lane.b32.xlu1 %v769_v55, %s3992_s20  ;;  %v4297_v0 = vld [vmem:[#allocation2 + $0x18] sm:$0xff]  ;;  %v4309_v6 = vsel %vm924_vm7, %v1412_v58, %v4290_v61  ;;  %v4313_v7 = vsel %vm755_vm4, %v768_v20, %v4293_v62  ;;  %v4317_v10 = vld [vmem:[#allocation2 + $0x20] sm:$0x3]  ;;  %v756_v32 = vrot.slane %v4319_v11, 1  ;;  %v757_v33 = vrot.slane %v4321_v13, 1  ;;  %v4371_v22 = vld [vmem:[%s4103_s14 + $0x68] sm:$0xff] }
  0x33   : > { %v761_v8 = vrot.slane %v4297_v0, 1  ;;  %v763_v19 = vrot.slane %v4317_v10, 1  ;;  %v1249_v28 = vsel %vm755_vm4, %v4293_v62, %v1248_v9  ;;  %v925_v31 = vrot.slane %v4319_v11, 2  ;;  %v532_v44 = vld [vmem:[%s4153_s10 + $0x80] sm:$0xff]  ;;  %v4374_v52 = vld [vmem:[%s4103_s14 + $0x70] sm:$0xff]  ;;  %v535_v9 = vld [vmem:[%s4153_s10 + $0x98] sm:$0xff] }
  0x34   : > { %v758_v30 = vsel %vm755_vm4, %v756_v32, %v757_v33  ;;  %v926_v38 = vrot.slane %v4321_v13, 2  ;;  %v928_v5 = vrot.slane %v4295_v63, 2  ;;  %v562_v41 = vadd.f32 %v530_v35, %v490_v29  ;;  %v4360_v45 = vld [vmem:[%s4103_s14 + $0x60] sm:$0xff]  ;;  %v534_v58 = vld [vmem:[%s4153_s10 + $0x90] sm:$0xff]  ;;  %v537_v29 = vld [vmem:[%s4153_s10 + $0xa8] sm:$0xff] }
  0x35   : > { %1313 = vrot.lane.b32.xlu0 %v767_v56, %s3992_s20  ;;  %v762_v25 = vsel %vm755_vm4, %v759_v4, %v761_v8  ;;  %v764_v37 = vsel %vm755_vm4, %v761_v8, %v763_v19  ;;  %v563_v12 = vadd.f32 %v531_v36, %v491_v34  ;;  %v760_v42 = vsel %vm755_vm4, %v757_v33, %v759_v4  ;;  %v533_v56 = vld [vmem:[%s4153_s10 + $0x88] sm:$0xff]  ;;  %v538_v34 = vld [vmem:[%s4153_s10 + $0xb0] sm:$0xff] }
  0x36   : > { %1481 = vrot.lane.b32.xlu1 %v4278_v57, %s3993_s28  ;;  %v452_v43 = vmul.f32 0.75, %v4204_v26  ;;  %v930_v49 = vrot.slane %v4297_v0, 2  ;;  %653 = vst.msk [vmem:[#allocation2 + $0xb1] sm:$0xff] %vm634_vm1, %v562_v41  ;;  %v453_v20 = vmul.f32 0.75, %v4207_v27  ;;  %v454_v50 = vmul.f32 0.75, %v413_v2 }
  0x37   : > { %654 = vst.msk [vmem:[#allocation2 + $0xb9] sm:$0xff] %vm634_vm1, %v563_v12  ;;  %v4368_v26 = vpack.c.bf16 %v1159_v24, %v1158_v23  ;;  %v927_v53 = vsel %vm924_vm7, %v925_v31, %v926_v38  ;;  %v1416_v54 = vrot.slane %v4299_v1, 2  ;;  %v455_v4 = vmul.f32 0.75, %v414_v3  ;;  %v536_v3 = vld [vmem:[%s4153_s10 + $0xa0] sm:$0xff]  ;;  %v4417_v31 = vld [vmem:[#allocation2 + $0x58] sm:$0xff] }
  0x38   : > { %v929_v8 = vsel %vm924_vm7, %v926_v38, %v928_v5  ;;  %v469_v27 = vadd.f32 %v453_v20, %v4127_v17  ;;  %v470_v2 = vadd.f32 %v454_v50, %v4129_v18  ;;  %v4389_v1 = vmul.f32 0.25, %v4360_v45 }
  0x39   : > { %1315 = vrot.lane.b32.xlu0 %v769_v55, %s3992_s20  ;;  %v468_v55 = vadd.f32 %v452_v43, %v4125_v16  ;;  %3802 = vmatprep.subr.msk.bf16.mxu0 %vm4262_vm6, %v4368_v26  ;;  %v471_v17 = vadd.f32 %v455_v4, %v4140_v21  ;;  %v4399_v18 = vmul.f32 0.25, %v4371_v22  ;;  %v4403_v19 = vmul.f32 0.25, %v4374_v52 }
  0x3a   : > { %1483 = vrot.lane.b32.xlu1 %v4287_v60, %s3993_s28  ;;  %3812 = vmatprep.subr.msk.bf16.mxu1 %vm4262_vm6, %v4368_v26  ;;  %v565_v32 = vadd.f32 %v533_v56, %v469_v27  ;;  %v566_v33 = vadd.f32 %v534_v58, %v470_v2  ;;  %v492_v35 = vadd.f32 %v4389_v1, %v452_v43  ;;  %v1251_v12 = vrot.slane %v4417_v31, 1  ;;  %v4435_v43 = vld [vmem:[%s4103_s14 + $0x78] sm:$0xff]  ;;  %v4461_v27 = vld [vmem:[#allocation2 + $0x68] sm:$0xff] }
  0x3b   : > { %v564_v16 = vadd.f32 %v532_v44, %v468_v55  ;;  %3805 = vmatpush3.bf16.msk.msra.mxu0 %vm4262_vm6, %v4368_v26  ;;  %5836 = vst [vmem:[#allocation3_spill] sm:$0xff] %v4403_v19  ;;  %v567_v21 = vadd.f32 %v535_v9, %v471_v17  ;;  %v493_v36 = vadd.f32 %v4399_v18, %v453_v20  ;;  %v4440_v44 = vmul.f32 0.25, %v4435_v43  ;;  %v539_v55 = vld [vmem:[%s4153_s10 + $0xb8] sm:$0xff]  ;;  %v684_v9 = vld [vmem:[#allocation2 + $0x48] sm:$0x3] }
  0x3c   : > { %656 = vst.msk [vmem:[#allocation2 + $0xd1] sm:$0xff] %vm634_vm1, %v565_v32  ;;  %657 = vst.msk [vmem:[#allocation2 + $0xd9] sm:$0xff] %vm634_vm1, %v566_v33  ;;  %v1417_v24 = vsel %vm924_vm7, %v4290_v61, %v1416_v54  ;;  %v772_v17 = vrot.slane %v684_v9, 1 }
  0x3d   : > { %1317 = vrot.lane.b32.xlu0 %v4313_v7, %s3992_s20  ;;  %655 = vst.msk [vmem:[#allocation2 + $0xc9] sm:$0xff] %vm634_vm1, %v564_v16  ;;  %658 = vst.msk [vmem:[#allocation2 + $0xe1] sm:$0xff] %vm634_vm1, %v567_v21  ;;  %v569_v38 = vadd.f32 %v537_v29, %v493_v36  ;;  %v495_v54 = vadd.f32 %v4440_v44, %v455_v4  ;;  %v4471_v4 = vrot.slane %v4461_v27, 1  ;;  %v541_v21 = vld [vmem:[%s4153_s10 + $0xc8] sm:$0xff] }
  0x3e   : > { %1485 = vrot.lane.b32.xlu1 %v4309_v6, %s3993_s28  ;;  %5837 = vst [vmem:[#allocation4_spill] sm:$0xff] %v4440_v44  ;;  %v773_v32 = vsel %vm755_vm4, %v4293_v62, %v772_v17  ;;  %v4565_v17 = vld [vmem:[#allocation2 + $0x90] sm:$0xff] }
  0x3f   : > { %660 = vst.msk [vmem:[#allocation2 + $0xf9] sm:$0xff] %vm634_vm1, %v569_v38  ;;  %v571_v2 = vadd.f32 %v539_v55, %v495_v54  ;;  %v542_v38 = vld [vmem:[%s4153_s10 + $0xd0] sm:$0xff]  ;;  %v543_v55 = vld [vmem:[%s4153_s10 + $0xd8] sm:$0xff] }
  0x41   : > { %1319 = vrot.lane.b32.xlu0 %v1249_v28, %s3992_s20  ;;  %v932_v28 = vrot.slane %v4317_v10, 2  ;;  %v568_v10 = vadd.f32 %v536_v3, %v492_v35  ;;  %662 = vst.msk [vmem:[#allocation2 + $0x109] sm:$0xff] %vm634_vm1, %v571_v2  ;;  %v1170_v3 = vld [vmem:[#allocation2 + $0x70] sm:$0x3]  ;;  %v941_v35 = vrot.slane %v684_v9, 2 }
  0x42   : > { %832 = vrot.lane.b32.xlu1 %v762_v25, %s3992_s20  ;;  %v931_v25 = vsel %vm924_vm7, %v928_v5, %v930_v49  ;;  %v1257_v33 = vrot.slane %v1170_v3, 1 }
  0x43   : > { %v933_v5 = vsel %vm924_vm7, %v930_v49, %v932_v28  ;;  %659 = vst.msk [vmem:[#allocation2 + $0xf1] sm:$0xff] %vm634_vm1, %v568_v10  ;;  %v4490_v28 = vmul.f32 0.75, %v4360_v45  ;;  %v4517_v10 = vld [vmem:[#allocation2 + $0x80] sm:$0xff] }
  0x44   : > { %v4712_v44 = vld [vmem:[#allocation2 + $0xc8] sm:$0xff] }
  0x45   : > { %828 = vrot.lane.b32.xlu0 %v758_v30, %s3992_s20  ;;  %v4415_v30 = vld [vmem:[#allocation2 + $0x50] sm:$0xff]  ;;  %v472_v29 = vadd.f32 %v4490_v28, %v4237_v39  ;;  %v1258_v39 = vsel %vm755_vm4, %v4471_v4, %v1257_v33  ;;  %5846 = vst [vmem:[#allocation13_spill] sm:$0xff] %v4712_v44 }
  0x46   : > { %834 = vrot.lane.b32.xlu1 %v764_v37, %s3992_s20  ;;  %v494_v37 = vadd.f32 %v4403_v19, %v454_v50  ;;  %v1250_v41 = vrot.slane %v4415_v30, 1  ;;  %v1418_v20 = vrot.slane %v4415_v30, 2  ;;  %v1419_v50 = vrot.slane %v4417_v31, 2 }
  0x48   : > { %v570_v23 = vadd.f32 %v538_v34, %v494_v37  ;;  %v4443_v49 = vsel %vm755_vm4, %v1250_v41, %v1251_v12  ;;  %v4455_v56 = vsel %vm924_vm7, %v1418_v20, %v1419_v50  ;;  %v4515_v37 = vld [vmem:[#allocation2 + $0x78] sm:$0xff] }
  0x49   : > { %830 = vrot.lane.b32.xlu0 %v760_v42, %s3992_s20  ;;  %v4432_v42 = vld [vmem:[#allocation2 + $0x60] sm:$0xff] }
  0x4a   : > { %997 = vrot.lane.b32.xlu1 %v927_v53, %s3993_s28  ;;  %661 = vst.msk [vmem:[#allocation2 + $0x101] sm:$0xff] %vm634_vm1, %v570_v23  ;;  %v1253_v53 = vrot.slane %v4432_v42, 1 }
  0x4c   : > { %v4458_v58 = vsel %vm755_vm4, %v1251_v12, %v1253_v53  ;;  %v4480_v16 = vsel %vm755_vm4, %v1253_v53, %v4471_v4  ;;  %v4539_v12 = vld [vmem:[#allocation2 + $0x88] sm:$0xff]  ;;  %v1428_v53 = vrot.slane %v4517_v10, 2 }
  0x4d   : > { %999 = vrot.lane.b32.xlu0 %v929_v8, %s3993_s28  ;;  %v1421_v8 = vrot.slane %v4432_v42, 2  ;;  %v1262_v20 = vrot.slane %v4539_v12, 1  ;;  %v1430_v9 = vrot.slane %v4539_v12, 2 }
  0x4e   : > { %1001 = vrot.lane.b32.xlu1 %v931_v25, %s3993_s28  ;;  %v4487_v25 = vrot.slane %v4461_v27, 2 }
  0x50   : > { %v4508_v45 = vsel %vm924_vm7, %v1421_v8, %v4487_v25 }
  0x51   : > { %1003 = vrot.lane.b32.xlu0 %v933_v5, %s3993_s28  ;;  %v1259_v5 = vrot.slane %v4515_v37, 1 }
  0x52   : > { %1487 = vrot.lane.b32.xlu1 %v1417_v24, %s3993_s28  ;;  %v942_v24 = vsel %vm924_vm7, %v4290_v61, %v941_v35  ;;  %v4546_v61 = vmul.f32 0.75, %v4435_v43 }
  0x54   : > { %v475_v54 = vadd.f32 %v4546_v61, %v4325_v15  ;;  %v4573_v15 = vsel %vm924_vm7, %v1428_v53, %v1430_v9 }
  0x55   : > { %1321 = vrot.lane.b32.xlu0 %v4443_v49, %s3992_s20 }
  0x56   : > { %1005 = vrot.lane.b32.xlu1 %v4278_v57, %s3993_s28  ;;  %v4468_v57 = vsel %vm924_vm7, %v1419_v50, %v1421_v8  ;;  %v1427_v50 = vrot.slane %v4515_v37, 2  ;;  %v575_v8 = vadd.f32 %v543_v55, %v475_v54  ;;  %v4620_v54 = vld [vmem:[#allocation2 + $0xa0] sm:$0xff]  ;;  %v4622_v55 = vld [vmem:[#allocation2 + $0xa8] sm:$0xff] }
  0x57   : > { %5839 = vst [vmem:[#allocation6_spill] sm:$0xff] %v4620_v54  ;;  %5840 = vst [vmem:[#allocation7_spill] sm:$0xff] %v4622_v55 }
  0x58   : > { %v4562_v2 = vsel %vm924_vm7, %v1427_v50, %v1428_v53  ;;  %666 = vst.msk [vmem:[#allocation2 + $0x131] sm:$0xff] %vm634_vm1, %v575_v8 }
  0x59   : > { %1323 = vrot.lane.b32.xlu0 %v4458_v58, %s3992_s20 }
  0x5a   : > { %1489 = vrot.lane.b32.xlu1 %v4455_v56, %s3993_s28 }
  0x5d   : > { %1007 = vrot.lane.b32.xlu0 %v4287_v60, %s3993_s28  ;;  %v4493_v60 = vmul.f32 0.75, %v4371_v22  ;;  %v4511_v22 = vmul.f32 0.75, %v4374_v52 }
  0x5e   : > { %1491 = vrot.lane.b32.xlu1 %v4468_v57, %s3993_s28 }
  0x5f   : > { %v473_v34 = vadd.f32 %v4493_v60, %v4240_v40  ;;  %v1425_v40 = vrot.slane %v1170_v3, 2  ;;  %v4576_v3 = vrot.slane %v4565_v17, 1 }
  0x61   : > { %840 = vrot.lane.b32.xlu0 %v4313_v7, %s3992_s20  ;;  %v540_v7 = vld [vmem:[%s4153_s10 + $0xc0] sm:$0xff]  ;;  %v573_v36 = vadd.f32 %v541_v21, %v473_v34  ;;  %v1426_v23 = vsel %vm924_vm7, %v4487_v25, %v1425_v40  ;;  %v4584_v33 = vsel %vm755_vm4, %v1262_v20, %v4576_v3  ;;  %v1175_v34 = vld [vmem:[#allocation2 + $0x98] sm:$0x3]  ;;  %v4590_v21 = vld [vmem:[%s4137_s30 + $0x28] sm:$0xff] }
  0x62   : > { %1325 = vrot.lane.b32.xlu1 %v4480_v16, %s3992_s20  ;;  %v572_v62 = vadd.f32 %v540_v7, %v472_v29  ;;  %v4587_v7 = vld [vmem:[%s4137_s30 + $0x20] sm:$0xff]  ;;  %v1266_v35 = vrot.slane %v1175_v34, 1 }
  0x63   : > { %664 = vst.msk [vmem:[#allocation2 + $0x121] sm:$0xff] %vm634_vm1, %v573_v36  ;;  %v4601_v36 = vrot.slane %v4565_v17, 2 }
  0x64   : > { %663 = vst.msk [vmem:[#allocation2 + $0x119] sm:$0xff] %vm634_vm1, %v572_v62  ;;  %v480_v62 = vmul.f32 0.25, %v4587_v7  ;;  %v1267_v50 = vsel %vm755_vm4, %v4576_v3, %v1266_v35  ;;  %v4646_v35 = vld [vmem:[%s4137_s30 + $0x38] sm:$0xff] }
  0x65   : > { %842 = vrot.lane.b32.xlu0 %v773_v32, %s3992_s20  ;;  %v689_v32 = vld [vmem:[#allocation2 + $0x70] sm:$0x3]  ;;  %5842 = vst [vmem:[#allocation9_spill] sm:$0xff] %v4646_v35 }
  0x66   : > { %1009 = vrot.lane.b32.xlu1 %v4309_v6, %s3993_s28  ;;  %v474_v6 = vadd.f32 %v4511_v22, %v4323_v14  ;;  %v1260_v14 = vrot.slane %v4517_v10, 1  ;;  %v781_v29 = vrot.slane %v689_v32, 1 }
  0x68   : > { %v574_v52 = vadd.f32 %v542_v38, %v474_v6  ;;  %v4537_v41 = vsel %vm755_vm4, %v1259_v5, %v1260_v14  ;;  %v4559_v43 = vsel %vm755_vm4, %v1260_v14, %v1262_v20  ;;  %v782_v40 = vsel %vm755_vm4, %v4471_v4, %v781_v29 }
  0x69   : > { %1327 = vrot.lane.b32.xlu0 %v1258_v39, %s3992_s20  ;;  %v481_v39 = vmul.f32 0.25, %v4590_v21  ;;  %v496_v6 = vadd.f32 %v480_v62, %v4490_v28  ;;  %v950_v5 = vrot.slane %v689_v32, 2  ;;  %v4618_v28 = vsel %vm924_vm7, %v1430_v9, %v4601_v36  ;;  %v546_v32 = vld [vmem:[%s4153_s10 + $0xf0] sm:$0xff] }
  0x6a   : > { %1493 = vrot.lane.b32.xlu1 %v4508_v45, %s3993_s28  ;;  %665 = vst.msk [vmem:[#allocation2 + $0x129] sm:$0xff] %vm634_vm1, %v574_v52  ;;  %v544_v52 = vld [vmem:[%s4153_s10 + $0xe0] sm:$0xff]  ;;  %v1268_v62 = vrot.slane %v4620_v54, 1 }
  0x6b   : > { %v497_v38 = vadd.f32 %v481_v39, %v4493_v60  ;;  %v576_v14 = vadd.f32 %v544_v52, %v496_v6  ;;  %v1434_v60 = vrot.slane %v1175_v34, 2  ;;  %v951_v29 = vsel %vm924_vm7, %v4487_v25, %v950_v5 }
  0x6c   : > { %v483_v6 = vmul.f32 0.25, %v4646_v35  ;;  %v1437_v52 = vrot.slane %v4622_v55, 2  ;;  %v4714_v35 = vld [vmem:[#allocation2 + $0xd0] sm:$0xff] }
  0x6d   : > { %1011 = vrot.lane.b32.xlu0 %v942_v24, %s3993_s28  ;;  %v4608_v24 = vld [vmem:[%s4137_s30 + $0x30] sm:$0xff]  ;;  %667 = vst.msk [vmem:[#allocation2 + $0x141] sm:$0xff] %vm634_vm1, %v576_v14  ;;  %v1435_v34 = vsel %vm924_vm7, %v4601_v36, %v1434_v60  ;;  %v547_v14 = vld [vmem:[%s4153_s10 + $0xf8] sm:$0xff]  ;;  %5847 = vst [vmem:[#allocation14_spill] sm:$0xff] %v4714_v35 }
  0x6e   : > { %1495 = vrot.lane.b32.xlu1 %v1426_v23, %s3993_s28  ;;  %v545_v23 = vld [vmem:[%s4153_s10 + $0xe8] sm:$0xff]  ;;  %5838 = vst [vmem:[#allocation5_spill] sm:$0xff] %v4608_v24  ;;  %v482_v20 = vmul.f32 0.25, %v4608_v24  ;;  %v499_v5 = vadd.f32 %v483_v6, %v4546_v61 }
  0x6f   : > { %v577_v53 = vadd.f32 %v545_v23, %v497_v38  ;;  %v1436_v38 = vrot.slane %v4620_v54, 2  ;;  %v4729_v54 = vld [vmem:[#allocation2 + $0xd8] sm:$0xff] }
  0x70   : > { %v498_v8 = vadd.f32 %v482_v20, %v4511_v22  ;;  %v1269_v22 = vrot.slane %v4622_v55, 1  ;;  %v579_v20 = vadd.f32 %v547_v14, %v499_v5  ;;  %v1278_v55 = vrot.slane %v4714_v35, 1  ;;  %5848 = vst [vmem:[#allocation15_spill] sm:$0xff] %v4729_v54 }
  0x71   : > { %844 = vrot.lane.b32.xlu0 %v4443_v49, %s3992_s20  ;;  %668 = vst.msk [vmem:[#allocation2 + $0x149] sm:$0xff] %vm634_vm1, %v577_v53  ;;  %v1280_v24 = vrot.slane %v4729_v54, 1 }
  0x72   : > { %1329 = vrot.lane.b32.xlu1 %v4537_v41, %s3992_s20  ;;  %v578_v9 = vadd.f32 %v546_v32, %v498_v8  ;;  %v4641_v39 = vsel %vm755_vm4, %v1268_v62, %v1269_v22  ;;  %v4669_v8 = vld [vmem:[#allocation2 + $0xb8] sm:$0xff]  ;;  %670 = vst.msk [vmem:[#allocation2 + $0x159] sm:$0xff] %vm634_vm1, %v579_v20  ;;  %v1180_v62 = vld [vmem:[#allocation2 + $0xc0] sm:$0x3] }
  0x73   : > { %5843 = vst [vmem:[#allocation10_spill] sm:$0xff] %v4669_v8  ;;  %v4680_v32 = vrot.slane %v4669_v8, 1  ;;  %v4697_v6 = vrot.slane %v4669_v8, 2  ;;  %v1443_v20 = vrot.slane %v1180_v62, 2 }
  0x74   : > { %669 = vst.msk [vmem:[#allocation2 + $0x151] sm:$0xff] %vm634_vm1, %v578_v9  ;;  %v694_v9 = vld [vmem:[#allocation2 + $0x98] sm:$0x3] }
  0x75   : > { %846 = vrot.lane.b32.xlu0 %v4458_v58, %s3992_s20  ;;  %5844 = vst [vmem:[#allocation11_spill] sm:$0xff] %v4697_v6 }
  0x76   : > { %1013 = vrot.lane.b32.xlu1 %v4455_v56, %s3993_s28 }
  0x79   : > { %1331 = vrot.lane.b32.xlu0 %v4559_v43, %s3992_s20 }
  0x7a   : > { %1497 = vrot.lane.b32.xlu1 %v4562_v2, %s3993_s28 }
  0x7d   : > { %1015 = vrot.lane.b32.xlu0 %v4468_v57, %s3993_s28 }
  0x7e   : > { %1499 = vrot.lane.b32.xlu1 %v4573_v15, %s3993_s28 }
  0x81   : > { %848 = vrot.lane.b32.xlu0 %v4480_v16, %s3992_s20 }
  0x82   : > { %1333 = vrot.lane.b32.xlu1 %v4584_v33, %s3992_s20 }
  0x85   : > { %850 = vrot.lane.b32.xlu0 %v782_v40, %s3992_s20  ;;  %v4643_v40 = vld [vmem:[#allocation2 + $0xb0] sm:$0xff] }
  0x86   : > { %1017 = vrot.lane.b32.xlu1 %v4508_v45, %s3993_s28  ;;  %5841 = vst [vmem:[#allocation8_spill] sm:$0xff] %v4643_v40  ;;  %v1271_v23 = vrot.slane %v4643_v40, 1  ;;  %v1439_v53 = vrot.slane %v4643_v40, 2 }
  0x88   : > { %v4666_v60 = vsel %vm755_vm4, %v1269_v22, %v1271_v23  ;;  %v4677_v61 = vsel %vm924_vm7, %v1437_v52, %v1439_v53 }
  0x89   : > { %1335 = vrot.lane.b32.xlu0 %v1267_v50, %s3992_s20  ;;  %v4663_v50 = vsel %vm924_vm7, %v1436_v38, %v1437_v52  ;;  %v1275_v38 = vrot.slane %v1180_v62, 1 }
  0x8a   : > { %1501 = vrot.lane.b32.xlu1 %v4618_v28, %s3993_s28 }
  0x8b   : > { %v1276_v14 = vsel %vm755_vm4, %v4680_v32, %v1275_v38  ;;  %v1277_v38 = vrot.slane %v4712_v44, 1 }
  0x8d   : > { %1019 = vrot.lane.b32.xlu0 %v951_v29, %s3993_s28  ;;  %v4688_v29 = vsel %vm755_vm4, %v1271_v23, %v4680_v32  ;;  %v4708_v23 = vsel %vm924_vm7, %v1439_v53, %v4697_v6 }
  0x8e   : > { %1503 = vrot.lane.b32.xlu1 %v1435_v34, %s3993_s28  ;;  %v790_v34 = vrot.slane %v694_v9, 1  ;;  %5845 = vst [vmem:[#allocation12_spill] sm:$0xff] %v4708_v23 }
  0x90   : > { %v791_v22 = vsel %vm755_vm4, %v4576_v3, %v790_v34  ;;  %v959_v34 = vrot.slane %v694_v9, 2  ;;  %v1444_v9 = vsel %vm924_vm7, %v4697_v6, %v1443_v20  ;;  %v1445_v6 = vrot.slane %v4712_v44, 2 }
  0x91   : > { %852 = vrot.lane.b32.xlu0 %v4537_v41, %s3992_s20 }
  0x92   : > { %1337 = vrot.lane.b32.xlu1 %v4641_v39, %s3992_s20  ;;  %v960_v62 = vsel %vm924_vm7, %v4601_v36, %v959_v34 }
  0x95   : > { %854 = vrot.lane.b32.xlu0 %v4559_v43, %s3992_s20 }
  0x96   : > { %1021 = vrot.lane.b32.xlu1 %v4562_v2, %s3993_s28 }
  0x99   : > { %1339 = vrot.lane.b32.xlu0 %v4666_v60, %s3992_s20 }
  0x9a   : > { %1505 = vrot.lane.b32.xlu1 %v4663_v50, %s3993_s28 }
  0x9d   : > { %1023 = vrot.lane.b32.xlu0 %v4573_v15, %s3993_s28 }
  0x9e   : > { %1507 = vrot.lane.b32.xlu1 %v4677_v61, %s3993_s28 }
  0xa1   : > { %856 = vrot.lane.b32.xlu0 %v4584_v33, %s3992_s20 }
  0xa2   : > { %1341 = vrot.lane.b32.xlu1 %v4688_v29, %s3992_s20 }
  0xa3   : > { %v4701_v5 = vpop.permute.xlu0 %836 }
  0xa4   : > { %v4699_v52 = vpop.permute.xlu1 %838 }
  0xa5   : > { %858 = vrot.lane.b32.xlu0 %v791_v22, %s3992_s20 }
  0xa6   : > { %1025 = vrot.lane.b32.xlu1 %v4618_v28, %s3993_s28 }
  0xa7   : > { %v1314_v40 = vpop.permute.xlu0 %1313 }
  0xa8   : > { %v1482_v8 = vpop.permute.xlu1 %1481  ;;  %v1577_v22 = vsel %vm634_vm1, %v4253_v48, %v1314_v40 }
  0xa9   : > { %1343 = vrot.lane.b32.xlu0 %v1276_v14, %s3992_s20  ;;  %v1609_v53 = vsel %vm1125_vm8, %v1577_v22, %v1482_v8  ;;  %v3498_v8 = vld [vmem:[%s5815_s4 + $0x20] sm:$0xff]  ;;  %v3499_v14 = vld [vmem:[%s5815_s4 + $0x28] sm:$0xf] }
  0xaa   : > { %1509 = vrot.lane.b32.xlu1 %v4708_v23, %s3993_s28  ;;  %3642 = vmatprep.mubr.msk.f32.mxu1 %vm1644_vm9, %v1609_v53  ;;  %v3806_v34 = vpack.c.bf16 %v3499_v14, %v3498_v8  ;;  %v4744_v53 = vsel %vm755_vm4, %v1277_v38, %v1278_v55  ;;  %v1446_v23 = vrot.slane %v4714_v35, 2  ;;  %v4766_v8 = vsel %vm755_vm4, %v1278_v55, %v1280_v24  ;;  %v1185_v35 = vld [vmem:[#allocation2 + $0xe8] sm:$0x3] }
  0xab   : > { %v1316_v19 = vpop.permute.xlu0 %1315 }
  0xac   : > { %v1484_v40 = vpop.permute.xlu1 %1483  ;;  %v1578_v20 = vsel %vm634_vm1, %v4249_v46, %v1316_v19  ;;  %3808 = vmatprep.subr.msk.bf16.mxu0 %vm4262_vm6, %v3806_v34 }
  0xad   : > { %1027 = vrot.lane.b32.xlu0 %v960_v62, %s3993_s28  ;;  %v1610_v22 = vsel %vm1125_vm8, %v1578_v20, %v1484_v40  ;;  %v4763_v40 = vsel %vm924_vm7, %v1445_v6, %v1446_v23 }
  0xae   : > { %1511 = vrot.lane.b32.xlu1 %v1444_v9, %s3993_s28  ;;  %3643 = vmatmul.mubr.msk.f32.vlgmr.msra.gmra.mrb[0].mxu1 %vm1644_vm9, %v1610_v22  ;;  %v1448_v22 = vrot.slane %v4729_v54, 2 }
  0xaf   : > { %v1318_v9 = vpop.permute.xlu0 %1317  ;;  %3813 = vmatpush3.bf16.msk.msra.mxu1 %vm4262_vm6, %v4368_v26 }
  0xb0   : > { %v1486_v19 = vpop.permute.xlu1 %1485  ;;  %v1579_v62 = vsel %vm634_vm1, %v4251_v47, %v1318_v9 }
  0xb1   : > { %1345 = vrot.lane.b32.xlu0 %v4744_v53, %s3992_s20  ;;  %v1611_v38 = vsel %vm1125_vm8, %v1579_v62, %v1486_v19  ;;  %v4773_v19 = vld [vmem:[#allocation2 + $0xe0] sm:$0xff]  ;;  %v4782_v62 = vsel %vm924_vm7, %v1446_v23, %v1448_v22 }
  0xb2   : > { %2447 = vrot.lane.b32.xlu1 %v4443_v49, %s3992_s20  ;;  %3645 = vmatprep.mubr.msk.f32.mxu1 %vm1644_vm9, %v1611_v38  ;;  %v4785_v38 = vrot.slane %v4773_v19, 1 }
  0xb3   : > { %v1320_v14 = vpop.permute.xlu0 %1319 }
  0xb4   : > { %v833_v26 = vpop.permute.xlu1 %832 }
  0xb5   : > { %1347 = vrot.lane.b32.xlu0 %v4766_v8, %s3992_s20 }
  0xb6   : > { %1513 = vrot.lane.b32.xlu1 %v4763_v40, %s3993_s28 }
  0xb7   : > { %v829_v20 = vpop.permute.xlu0 %828 }
  0xb8   : > { %v835_v49 = vpop.permute.xlu1 %834  ;;  %v1093_v55 = vsel %vm634_vm1, %v4319_v11, %v829_v20  ;;  %v4794_v11 = vrot.slane %v4773_v19, 2 }
  0xb9   : > { %2449 = vrot.lane.b32.xlu0 %v4458_v58, %s3992_s20 }
  0xba   : > { %2615 = vrot.lane.b32.xlu1 %v4455_v56, %s3993_s28  ;;  %v1095_v56 = vsel %vm634_vm1, %v4295_v63, %v833_v26 }
  0xbb   : > { %v831_v9 = vpop.permute.xlu0 %830 }
  0xbc   : > { %v998_v6 = vpop.permute.xlu1 %997  ;;  %v1094_v58 = vsel %vm634_vm1, %v4321_v13, %v831_v9  ;;  %v1580_v13 = vsel %vm634_vm1, %v4281_v59, %v1320_v14  ;;  %v1097_v14 = vsel %vm634_vm1, %v4253_v48, %v4701_v5 }
  0xbd   : > { %v1126_v54 = vsel %vm1125_vm8, %v1093_v55, %v998_v6  ;;  %1515 = vrot.lane.b32.xlu0 %v4782_v62, %s3993_s28  ;;  %v1284_v55 = vrot.slane %v1185_v35, 1 }
  0xbe   : > { %3694 = vmatprep.mubr.msk.f32.mxu0 %vm1644_vm9, %v1126_v54  ;;  %2617 = vrot.lane.b32.xlu1 %v4468_v57, %s3993_s28  ;;  %v4802_v54 = vsel %vm755_vm4, %v1280_v24, %v4785_v38  ;;  %v2299_v57 = vld [vmem:[#allocation2 + $0x70] sm:$0x3]  ;;  %v1096_v24 = vsel %vm634_vm1, %v4297_v0, %v835_v49 }
  0xbf   : > { %v1000_v20 = vpop.permute.xlu0 %999  ;;  %v2382_v63 = vrot.slane %v2299_v57, 1  ;;  %v2550_v0 = vrot.slane %v2299_v57, 2 }
  0xc0   : > { %v1002_v23 = vpop.permute.xlu1 %1001  ;;  %v1127_v44 = vsel %vm1125_vm8, %v1094_v58, %v1000_v20  ;;  %v4837_v20 = vld [vmem:[#allocation2 + $0xf0] sm:$0xff] }
  0xc1   : > { %v1128_v6 = vsel %vm1125_vm8, %v1095_v56, %v1002_v23  ;;  %3695 = vmatmul.mubr.msk.f32.vlgmr.msra.gmra.mrb[0].mxu0 %vm1644_vm9, %v1127_v44  ;;  %1349 = vrot.lane.b32.xlu0 %v4802_v54, %s3992_s20  ;;  %v4818_v44 = vsel %vm924_vm7, %v1448_v22, %v4794_v11  ;;  %v2383_v49 = vsel %vm755_vm4, %v4471_v4, %v2382_v63  ;;  %v1452_v22 = vrot.slane %v1185_v35, 2 }
  0xc2   : > { %2451 = vrot.lane.b32.xlu1 %v4480_v16, %s3992_s20  ;;  %3697 = vmatprep.mubr.msk.f32.mxu0 %vm1644_vm9, %v1128_v6  ;;  %v1285_v16 = vsel %vm755_vm4, %v4785_v38, %v1284_v55  ;;  %v4839_v55 = vld [vmem:[#allocation2 + $0xf8] sm:$0xff]  ;;  %v2551_v48 = vsel %vm924_vm7, %v4487_v25, %v2550_v0  ;;  %v1286_v6 = vrot.slane %v4837_v20, 1  ;;  %v1454_v25 = vrot.slane %v4837_v20, 2 }
  0xc3   : > { %v1004_v9 = vpop.permute.xlu0 %1003  ;;  %3811 = vmatpush3.bf16.msk.msra.mxu0 %vm4262_vm6, %v3806_v34  ;;  %v1453_v57 = vsel %vm924_vm7, %v4794_v11, %v1452_v22  ;;  %v1287_v63 = vrot.slane %v4839_v55, 1 }
  0xc4   : > { %v1488_v26 = vpop.permute.xlu1 %1487  ;;  %v1129_v58 = vsel %vm1125_vm8, %v1096_v24, %v1004_v9  ;;  %v1455_v24 = vrot.slane %v4839_v55, 2 }
  0xc5   : > { %v1612_v56 = vsel %vm1125_vm8, %v1580_v13, %v1488_v26  ;;  %3698 = vmatmul.mubr.msk.f32.gmra.mrb[2].mxu0 %vm1644_vm9, %v1129_v58  ;;  %1351 = vrot.lane.b32.xlu0 %v1285_v16, %s3992_s20  ;;  %v1098_v26 = vsel %vm634_vm1, %v4249_v46, %v4699_v52  ;;  %v4867_v58 = vsel %vm755_vm4, %v1286_v6, %v1287_v63 }
  0xc6   : > { %3646 = vmatmul.mubr.msk.f32.gmra.mrb[2].mxu1 %vm1644_vm9, %v1612_v56  ;;  %1517 = vrot.lane.b32.xlu1 %v4818_v44, %s3993_s28 }
  0xc7   : > { %v1322_v34 = vpop.permute.xlu0 %1321 }
  0xc8   : > { %v1006_v51 = vpop.permute.xlu1 %1005  ;;  %v1581_v4 = vsel %vm634_vm1, %v4415_v30, %v1322_v34  ;;  %v4879_v34 = vsel %vm924_vm7, %v1454_v25, %v1455_v24  ;;  %v1190_v25 = vld [vmem:[#allocation2 + $0x110] sm:$0x3] }
  0xc9   : > { %v1130_v23 = vsel %vm1125_vm8, %v1097_v14, %v1006_v51  ;;  %2453 = vrot.lane.b32.xlu0 %v2383_v49, %s3992_s20 }
  0xca   : > { %3700 = vmatprep.mubr.msk.f32.mxu0 %vm1644_vm9, %v1130_v23  ;;  %2619 = vrot.lane.b32.xlu1 %v4508_v45, %s3993_s28  ;;  %v4854_v45 = vld [vmem:[#allocation2 + $0x100] sm:$0xff] }
  0xcb   : > { %v1324_v5 = vpop.permute.xlu0 %1323  ;;  %v1289_v0 = vrot.slane %v4854_v45, 1 }
  0xcc   : > { %v1490_v35 = vpop.permute.xlu1 %1489  ;;  %v1582_v9 = vsel %vm634_vm1, %v4417_v31, %v1324_v5 }
  0xcd   : > { %v1613_v13 = vsel %vm1125_vm8, %v1581_v4, %v1490_v35  ;;  %1519 = vrot.lane.b32.xlu0 %v1453_v57, %s3993_s28  ;;  %v4882_v49 = vsel %vm755_vm4, %v1287_v63, %v1289_v0  ;;  %v4892_v35 = vld [vmem:[#allocation2 + $0x108] sm:$0xff] }
  0xce   : > { %3648 = vmatprep.mubr.msk.f32.mxu1 %vm1644_vm9, %v1613_v13  ;;  %2621 = vrot.lane.b32.xlu1 %v2551_v48, %s3993_s28  ;;  %v1457_v48 = vrot.slane %v4854_v45, 2  ;;  %v4905_v63 = vrot.slane %v4892_v35, 1 }
  0xcf   : > { %v1008_v56 = vpop.permute.xlu0 %1007 }
  0xd0   : > { %v1492_v16 = vpop.permute.xlu1 %1491  ;;  %v1131_v51 = vsel %vm1125_vm8, %v1098_v26, %v1008_v56  ;;  %v4902_v6 = vsel %vm924_vm7, %v1455_v24, %v1457_v48  ;;  %v1293_v56 = vrot.slane %v1190_v25, 1 }
  0xd1   : > { %v1614_v14 = vsel %vm1125_vm8, %v1582_v9, %v1492_v16  ;;  %3701 = vmatmul.mubr.msk.f32.gmra.mrb[4].mxu0 %vm1644_vm9, %v1131_v51  ;;  %1353 = vrot.lane.b32.xlu0 %v4867_v58, %s3992_s20  ;;  %v4922_v16 = vsel %vm755_vm4, %v1289_v0, %v4905_v63  ;;  %v2304_v51 = vld [vmem:[#allocation2 + $0x98] sm:$0x3] }
  0xd2   : > { %3649 = vmatmul.mubr.msk.f32.gmra.mrb[4].mxu1 %vm1644_vm9, %v1614_v14  ;;  %2455 = vrot.lane.b32.xlu1 %v4537_v41, %s3992_s20 }
  0xd3   : > { %v841_v52 = vpop.permute.xlu0 %840 }
  0xd4   : > { %v1326_v46 = vpop.permute.xlu1 %1325  ;;  %v1099_v41 = vsel %vm634_vm1, %v4251_v47, %v841_v52  ;;  %v1294_v52 = vsel %vm755_vm4, %v4905_v63, %v1293_v56 }
  0xd5   : > { %1355 = vrot.lane.b32.xlu0 %v4882_v49, %s3992_s20  ;;  %v1583_v5 = vsel %vm634_vm1, %v4432_v42, %v1326_v46 }
  0xd6   : > { %1521 = vrot.lane.b32.xlu1 %v4879_v34, %s3993_s28 }
  0xd7   : > { %v843_v23 = vpop.permute.xlu0 %842 }
  0xd8   : > { %v1010_v22 = vpop.permute.xlu1 %1009 }
  0xd9   : > { %v1132_v4 = vsel %vm1125_vm8, %v1099_v41, %v1010_v22  ;;  %2457 = vrot.lane.b32.xlu0 %v4559_v43, %s3992_s20  ;;  %v4914_v43 = vrot.slane %v4892_v35, 2  ;;  %v2391_v41 = vrot.slane %v2304_v51, 1 }
  0xda   : > { %3703 = vmatprep.mubr.msk.f32.mxu0 %vm1644_vm9, %v1132_v4  ;;  %2623 = vrot.lane.b32.xlu1 %v4562_v2, %s3993_s28  ;;  %v1100_v2 = vsel %vm634_vm1, %v4281_v59, %v843_v23 }
  0xdb   : > { %v1328_v57 = vpop.permute.xlu0 %1327  ;;  %v4934_v0 = vsel %vm924_vm7, %v1457_v48, %v4914_v43  ;;  %v2392_v4 = vsel %vm755_vm4, %v4576_v3, %v2391_v41  ;;  %v1461_v48 = vrot.slane %v1190_v25, 2 }
  0xdc   : > { %v1494_v47 = vpop.permute.xlu1 %1493  ;;  %v1584_v24 = vsel %vm634_vm1, %v4461_v27, %v1328_v57  ;;  %v4947_v57 = vld [vmem:[#allocation2 + $0x120] sm:$0xff] }
  0xdd   : > { %v1615_v13 = vsel %vm1125_vm8, %v1583_v5, %v1494_v47  ;;  %1523 = vrot.lane.b32.xlu0 %v4902_v6, %s3993_s28  ;;  %v2559_v5 = vrot.slane %v2304_v51, 2  ;;  %v4945_v47 = vld [vmem:[#allocation2 + $0x118] sm:$0xff] }
  0xde   : > { %3651 = vmatprep.mubr.msk.f32.mxu1 %vm1644_vm9, %v1615_v13  ;;  %2625 = vrot.lane.b32.xlu1 %v4573_v15, %s3993_s28 }
  0xdf   : > { %v1012_v9 = vpop.permute.xlu0 %1011 }
  0xe0   : > { %v1496_v26 = vpop.permute.xlu1 %1495  ;;  %v1133_v14 = vsel %vm1125_vm8, %v1100_v2, %v1012_v9  ;;  %v1296_v2 = vrot.slane %v4947_v57, 1  ;;  %v1462_v9 = vsel %vm924_vm7, %v4914_v43, %v1461_v48 }
  0xe1   : > { %v1616_v15 = vsel %vm1125_vm8, %v1584_v24, %v1496_v26  ;;  %3704 = vmatmul.mubr.msk.f32.gmra.mrb[6].mxu0 %vm1644_vm9, %v1133_v14  ;;  %1357 = vrot.lane.b32.xlu0 %v4922_v16, %s3992_s20  ;;  %v2560_v26 = vsel %vm924_vm7, %v4601_v36, %v2559_v5  ;;  %v1463_v14 = vrot.slane %v4945_v47, 2 }
  0xe2   : > { %3652 = vmatmul.mubr.msk.f32.gmra.mrb[6].mxu1 %vm1644_vm9, %v1616_v15  ;;  %2459 = vrot.lane.b32.xlu1 %v4584_v33, %s3992_s20 }
  0xe3   : > { %v845_v59 = vpop.permute.xlu0 %844 }
  0xe4   : > { %v1330_v46 = vpop.permute.xlu1 %1329  ;;  %v1101_v33 = vsel %vm634_vm1, %v4415_v30, %v845_v59  ;;  %v1295_v30 = vrot.slane %v4945_v47, 1 }
  0xe5   : > { %1359 = vrot.lane.b32.xlu0 %v1294_v52, %s3992_s20  ;;  %v1585_v3 = vsel %vm634_vm1, %v4515_v37, %v1330_v46  ;;  %v1464_v52 = vrot.slane %v4947_v57, 2 }
  0xe6   : > { %1525 = vrot.lane.b32.xlu1 %v4934_v0, %s3993_s28  ;;  %v4969_v15 = vsel %vm755_vm4, %v1295_v30, %v1296_v2 }
  0xe7   : > { %v847_v22 = vpop.permute.xlu0 %846 }
  0xe8   : > { %v1014_v23 = vpop.permute.xlu1 %1013  ;;  %v1102_v36 = vsel %vm634_vm1, %v4417_v31, %v847_v22 }
  0xe9   : > { %v1134_v13 = vsel %vm1125_vm8, %v1101_v33, %v1014_v23  ;;  %2461 = vrot.lane.b32.xlu0 %v2392_v4, %s3992_s20  ;;  %v4987_v4 = vsel %vm924_vm7, %v1463_v14, %v1464_v52  ;;  %v1195_v14 = vld [vmem:[#allocation2 + $0x138] sm:$0x3] }
  0xea   : > { %3706 = vmatprep.mubr.msk.f32.mxu0 %vm1644_vm9, %v1134_v13  ;;  %2627 = vrot.lane.b32.xlu1 %v4618_v28, %s3993_s28  ;;  %v4963_v28 = vld [vmem:[#allocation2 + $0x128] sm:$0xff] }
  0xeb   : > { %v1332_v25 = vpop.permute.xlu0 %1331  ;;  %v1298_v41 = vrot.slane %v4963_v28, 1  ;;  %v1466_v30 = vrot.slane %v4963_v28, 2 }
  0xec   : > { %v1498_v24 = vpop.permute.xlu1 %1497  ;;  %v1586_v51 = vsel %vm634_vm1, %v4517_v10, %v1332_v25 }
  0xed   : > { %v1617_v56 = vsel %vm1125_vm8, %v1585_v3, %v1498_v24  ;;  %1527 = vrot.lane.b32.xlu0 %v1462_v9, %s3993_s28  ;;  %v4990_v5 = vsel %vm755_vm4, %v1296_v2, %v1298_v41  ;;  %v4999_v3 = vld [vmem:[#allocation2 + $0x130] sm:$0xff]  ;;  %v5013_v9 = vsel %vm924_vm7, %v1464_v52, %v1466_v30  ;;  %v1302_v52 = vrot.slane %v1195_v14, 1 }
  0xee   : > { %3654 = vmatprep.mubr.msk.f32.mxu1 %vm1644_vm9, %v1617_v56  ;;  %2629 = vrot.lane.b32.xlu1 %v2560_v26, %s3993_s28  ;;  %v5008_v2 = vrot.slane %v4999_v3, 1 }
  0xef   : > { %v1016_v59 = vpop.permute.xlu0 %1015 }
  0xf0   : > { %v1500_v46 = vpop.permute.xlu1 %1499  ;;  %v1135_v33 = vsel %vm1125_vm8, %v1102_v36, %v1016_v59 }
  0xf1   : > { %v1618_v23 = vsel %vm1125_vm8, %v1586_v51, %v1500_v46  ;;  %3707 = vmatmul.mubr.msk.f32.gmra.mrb[8].mxu0 %vm1644_vm9, %v1135_v33  ;;  %1361 = vrot.lane.b32.xlu0 %v4969_v15, %s3992_s20  ;;  %v5030_v46 = vrot.slane %v4999_v3, 2 }
  0xf2   : > { %3655 = vmatmul.mubr.msk.f32.gmra.mrb[8].mxu1 %vm1644_vm9, %v1618_v23  ;;  %2463 = vrot.lane.b32.xlu1 %v4641_v39, %s3992_s20  ;;  %v509_v23 = vmul.f32 0.75, %v4590_v21 }
  0xf3   : > { %v849_v31 = vpop.permute.xlu0 %848 }
  0xf4   : > { %v1334_v22 = vpop.permute.xlu1 %1333  ;;  %v1103_v39 = vsel %vm634_vm1, %v4432_v42, %v849_v31  ;;  %v513_v21 = vadd.f32 %v509_v23, %v4399_v18 }
  0xf5   : > { %1363 = vrot.lane.b32.xlu0 %v4990_v5, %s3992_s20  ;;  %v1587_v42 = vsel %vm634_vm1, %v4539_v12, %v1334_v22 }
  0xf6   : > { %1529 = vrot.lane.b32.xlu1 %v4987_v4, %s3993_s28 }
  0xf7   : > { %v851_v48 = vpop.permute.xlu0 %850 }
  0xf8   : > { %v1018_v13 = vpop.permute.xlu1 %1017 }
  0xf9   : > { %v1136_v25 = vsel %vm1125_vm8, %v1103_v39, %v1018_v13  ;;  %2465 = vrot.lane.b32.xlu0 %v4666_v60, %s3992_s20  ;;  %v1104_v60 = vsel %vm634_vm1, %v4461_v27, %v851_v48  ;;  %v508_v27 = vmul.f32 0.75, %v4587_v7  ;;  %v5044_v48 = vsel %vm924_vm7, %v1466_v30, %v5030_v46 }
  0xfa   : > { %3709 = vmatprep.mubr.msk.f32.mxu0 %vm1644_vm9, %v1136_v25  ;;  %2631 = vrot.lane.b32.xlu1 %v4663_v50, %s3993_s28  ;;  %v5023_v50 = vsel %vm755_vm4, %v1298_v41, %v5008_v2  ;;  %v1303_v13 = vsel %vm755_vm4, %v5008_v2, %v1302_v52  ;;  %v3427_v25 = vld [vmem:[%s4170_s13 + $0x28] sm:$0xff] }
  0xfb   : > { %v1336_v24 = vpop.permute.xlu0 %1335  ;;  %v512_v7 = vadd.f32 %v508_v27, %v4389_v1  ;;  %v5067_v52 = vld [vmem:[#allocation2 + $0x148] sm:$0xff] }
  0xfc   : > { %v1502_v26 = vpop.permute.xlu1 %1501  ;;  %v1588_v36 = vsel %vm634_vm1, %v4565_v17, %v1336_v24  ;;  %v594_v24 = vadd.f32 %v3427_v25, %v513_v21  ;;  %v1305_v23 = vrot.slane %v5067_v52, 1  ;;  %v5854_v21 = vld [vmem:[#allocation11_spill] sm:$0xff] }
  0xfd   : > { %v1619_v56 = vsel %vm1125_vm8, %v1587_v42, %v1502_v26  ;;  %1531 = vrot.lane.b32.xlu0 %v5013_v9, %s3993_s28  ;;  %v607_v26 = vstv %s606_s15 }
  0xfe   : > { %3657 = vmatprep.mubr.msk.f32.mxu1 %vm1644_vm9, %v1619_v56  ;;  %2633 = vrot.lane.b32.xlu1 %v4677_v61, %s3993_s28  ;;  %v2309_v61 = vld [vmem:[#allocation2 + $0xc0] sm:$0x3]  ;;  %vm5059_vm10 = vcmp.eq.s32.totalorder %v607_v26, 1 }
  0xff   : > { %v1020_v51 = vpop.permute.xlu0 %1019  ;;  %v2400_v31 = vrot.slane %v2309_v61, 1  ;;  %v2568_v56 = vrot.slane %v2309_v61, 2 }
 0x100   : > { %v1504_v59 = vpop.permute.xlu1 %1503  ;;  %v1137_v33 = vsel %vm1125_vm8, %v1104_v60, %v1020_v51  ;;  %v1470_v51 = vrot.slane %v1195_v14, 2 }
 0x101   : > { %v1620_v41 = vsel %vm1125_vm8, %v1588_v36, %v1504_v59  ;;  %3710 = vmatmul.mubr.msk.f32.gmra.mrb[10].mxu0 %vm1644_vm9, %v1137_v33  ;;  %1365 = vrot.lane.b32.xlu0 %v5023_v50, %s3992_s20  ;;  %v2401_v30 = vsel %vm755_vm4, %v4680_v32, %v2400_v31  ;;  %v5065_v59 = vld [vmem:[#allocation2 + $0x140] sm:$0xff]  ;;  %v610_v32 = vsel %vm5059_vm10, %v594_v24, 0.0  ;;  %v5853_v31 = vld [vmem:[#allocation6_spill] sm:$0xff] }
 0x102   : > { %3658 = vmatmul.mubr.msk.f32.gmra.mrb[10].mxu1 %vm1644_vm9, %v1620_v41  ;;  %2467 = vrot.lane.b32.xlu1 %v4688_v29, %s3992_s20  ;;  %v3426_v29 = vld [vmem:[%s4170_s13 + $0x20] sm:$0xff]  ;;  %672 = vst.msk [vmem:[#allocation2 + $0x171] sm:$0xff] %vm634_vm1, %v610_v32  ;;  %v5852_v41 = vld [vmem:[#allocation12_spill] sm:$0xff]  ;;  %v1304_v27 = vrot.slane %v5065_v59, 1  ;;  %v1471_v25 = vsel %vm924_vm7, %v5030_v46, %v1470_v51  ;;  %v1473_v51 = vrot.slane %v5067_v52, 2  ;;  %v5856_v32 = vld [vmem:[#allocation7_spill] sm:$0xff] }
 0x103   : > { %v853_v39 = vpop.permute.xlu0 %852  ;;  %v593_v42 = vadd.f32 %v3426_v29, %v512_v7  ;;  %v2569_v29 = vsel %vm924_vm7, %v5854_v21, %v2568_v56  ;;  %v1472_v56 = vrot.slane %v5065_v59, 2 }
 0x104   : > { %v1338_v22 = vpop.permute.xlu1 %1337  ;;  %v1105_v18 = vsel %vm634_vm1, %v4515_v37, %v853_v39  ;;  %v5851_v37 = vld [vmem:[#allocation5_spill] sm:$0xff] }
 0x105   : > { %1367 = vrot.lane.b32.xlu0 %v1303_v13, %s3992_s20  ;;  %v609_v33 = vsel %vm5059_vm10, %v593_v42, 0.0  ;;  %v510_v14 = vmul.f32 0.75, %v5851_v37  ;;  %v1589_v39 = vsel %vm634_vm1, %v5853_v31, %v1338_v22  ;;  %v5855_v42 = vld [vmem:[#allocation3_spill] sm:$0xff]  ;;  %v5098_v22 = vsel %vm755_vm4, %v1304_v27, %v1305_v23 }
 0x106   : > { %1533 = vrot.lane.b32.xlu1 %v5044_v48, %s3993_s28  ;;  %671 = vst.msk [vmem:[#allocation2 + $0x169] sm:$0xff] %vm634_vm1, %v609_v33  ;;  %v5120_v21 = vsel %vm924_vm7, %v1472_v56, %v1473_v51 }
 0x107   : > { %v855_v36 = vpop.permute.xlu0 %854  ;;  %v514_v24 = vadd.f32 %v510_v14, %v5855_v42 }
 0x108   : > { %v1022_v60 = vpop.permute.xlu1 %1021  ;;  %v1106_v33 = vsel %vm634_vm1, %v4517_v10, %v855_v36  ;;  %v5857_v10 = vld [vmem:[#allocation9_spill] sm:$0xff] }
 0x109   : > { %v1138_v61 = vsel %vm1125_vm8, %v1105_v18, %v1022_v60  ;;  %2469 = vrot.lane.b32.xlu0 %v2401_v30, %s3992_s20  ;;  %v5091_v30 = vld [vmem:[#allocation2 + $0x150] sm:$0xff]  ;;  %v511_v36 = vmul.f32 0.75, %v5857_v10 }
 0x10a   : > { %3712 = vmatprep.mubr.msk.f32.mxu0 %vm1644_vm9, %v1138_v61  ;;  %2635 = vrot.lane.b32.xlu1 %v5852_v41, %s3993_s28  ;;  %v3428_v18 = vld [vmem:[%s4170_s13 + $0x30] sm:$0xff]  ;;  %v1307_v41 = vrot.slane %v5091_v30, 1  ;;  %v1475_v56 = vrot.slane %v5091_v30, 2 }
 0x10b   : > { %v1340_v7 = vpop.permute.xlu0 %1339  ;;  %v595_v60 = vadd.f32 %v3428_v18, %v514_v24  ;;  %v3429_v24 = vld [vmem:[%s4170_s13 + $0x38] sm:$0xff] }
 0x10c   : > { %v1506_v13 = vpop.permute.xlu1 %1505  ;;  %v1590_v61 = vsel %vm634_vm1, %v5856_v32, %v1340_v7 }
 0x10d   : > { %v1621_v26 = vsel %vm1125_vm8, %v1589_v39, %v1506_v13  ;;  %1535 = vrot.lane.b32.xlu0 %v1471_v25, %s3993_s28  ;;  %v611_v31 = vsel %vm5059_vm10, %v595_v60, 0.0  ;;  %v5858_v25 = vld [vmem:[#allocation4_spill] sm:$0xff] }
 0x10e   : > { %3660 = vmatprep.mubr.msk.f32.mxu1 %vm1644_vm9, %v1621_v26  ;;  %2637 = vrot.lane.b32.xlu1 %v2569_v29, %s3993_s28  ;;  %673 = vst.msk [vmem:[#allocation2 + $0x179] sm:$0xff] %vm634_vm1, %v611_v31  ;;  %v5123_v29 = vsel %vm755_vm4, %v1305_v23, %v1307_v41  ;;  %v515_v42 = vadd.f32 %v511_v36, %v5858_v25 }
 0x10f   : > { %v1024_v14 = vpop.permute.xlu0 %1023  ;;  %v5151_v31 = vsel %vm924_vm7, %v1473_v51, %v1475_v56  ;;  %v5860_v51 = vld [vmem:[#allocation10_spill] sm:$0xff] }
 0x110   : > { %v1508_v37 = vpop.permute.xlu1 %1507  ;;  %v1139_v39 = vsel %vm1125_vm8, %v1106_v33, %v1024_v14  ;;  %v596_v26 = vadd.f32 %v3429_v24, %v515_v42  ;;  %v5134_v33 = vld [vmem:[#allocation2 + $0x158] sm:$0xff]  ;;  %v2314_v24 = vld [vmem:[#allocation2 + $0xe8] sm:$0x3] }
 0x111   : > { %v1622_v27 = vsel %vm1125_vm8, %v1590_v61, %v1508_v37  ;;  %3713 = vmatmul.mubr.msk.f32.gmra.mrb[12].mxu0 %vm1644_vm9, %v1139_v39  ;;  %1369 = vrot.lane.b32.xlu0 %v5098_v22, %s3992_s20  ;;  %v5859_v61 = vld [vmem:[#allocation8_spill] sm:$0xff]  ;;  %v1200_v39 = vld [vmem:[#allocation2 + $0x160] sm:$0x3] }
 0x112   : > { %3661 = vmatmul.mubr.msk.f32.gmra.mrb[12].mxu1 %vm1644_vm9, %v1622_v27  ;;  %2471 = vrot.lane.b32.xlu1 %v4744_v53, %s3992_s20  ;;  %v612_v23 = vsel %vm5059_vm10, %v596_v26, 0.0  ;;  %v1311_v25 = vrot.slane %v1200_v39, 1 }
 0x113   : > { %v857_v7 = vpop.permute.xlu0 %856  ;;  %674 = vst.msk [vmem:[#allocation2 + $0x181] sm:$0xff] %vm634_vm1, %v612_v23 }
 0x114   : > { %v1342_v13 = vpop.permute.xlu1 %1341  ;;  %v1107_v53 = vsel %vm634_vm1, %v4539_v12, %v857_v7  ;;  %v5146_v12 = vrot.slane %v5134_v33, 1  ;;  %v5168_v7 = vrot.slane %v5134_v33, 2 }
 0x115   : > { %1371 = vrot.lane.b32.xlu0 %v5123_v29, %s3992_s20  ;;  %v1591_v37 = vsel %vm634_vm1, %v5859_v61, %v1342_v13 }
 0x116   : > { %1537 = vrot.lane.b32.xlu1 %v5120_v21, %s3993_s28  ;;  %v5180_v26 = vsel %vm924_vm7, %v1475_v56, %v5168_v7  ;;  %v1479_v56 = vrot.slane %v1200_v39, 2 }
 0x117   : > { %v859_v60 = vpop.permute.xlu0 %858 }
 0x118   : > { %v1026_v18 = vpop.permute.xlu1 %1025 }
 0x119   : > { %v1140_v32 = vsel %vm1125_vm8, %v1107_v53, %v1026_v18  ;;  %2473 = vrot.lane.b32.xlu0 %v4766_v8, %s3992_s20  ;;  %v1108_v8 = vsel %vm634_vm1, %v4565_v17, %v859_v60  ;;  %v1312_v53 = vsel %vm755_vm4, %v5146_v12, %v1311_v25  ;;  %v2409_v18 = vrot.slane %v2314_v24, 1  ;;  %v5861_v60 = vld [vmem:[#allocation13_spill] sm:$0xff] }
 0x11a   : > { %3715 = vmatprep.mubr.msk.f32.mxu0 %vm1644_vm9, %v1140_v32  ;;  %2639 = vrot.lane.b32.xlu1 %v4763_v40, %s3993_s28  ;;  %v5161_v40 = vsel %vm755_vm4, %v1307_v41, %v5146_v12  ;;  %v1480_v25 = vsel %vm924_vm7, %v5168_v7, %v1479_v56 }
 0x11b   : > { %v1344_v14 = vpop.permute.xlu0 %1343  ;;  %v2410_v61 = vsel %vm755_vm4, %v4785_v38, %v2409_v18  ;;  %v3922_v38 = vld [vmem:[#allocation2 + $0x50] sm:$0xff] }
 0x11c   : > { %v1510_v1 = vpop.permute.xlu1 %1509  ;;  %v1592_v10 = vsel %vm634_vm1, %v5860_v51, %v1344_v14  ;;  %v5193_v14 = vld [vmem:[#allocation2 + $0xa8] sm:$0xff] }
 0x11d   : > { %v1623_v27 = vsel %vm1125_vm8, %v1591_v37, %v1510_v1  ;;  %1539 = vrot.lane.b32.xlu0 %v5151_v31, %s3993_s28  ;;  %v2577_v37 = vrot.slane %v2314_v24, 2  ;;  %v5191_v1 = vld [vmem:[#allocation2 + $0xa0] sm:$0xff]  ;;  %v793_v51 = vrot.slane %v5193_v14, 1  ;;  %v3923_v24 = vld [vmem:[#allocation2 + $0x58] sm:$0xff] }
 0x11e   : > { %3663 = vmatprep.mubr.msk.f32.mxu1 %vm1644_vm9, %v1623_v27  ;;  %2641 = vrot.lane.b32.xlu1 %v4782_v62, %s3993_s28 }
 0x11f   : > { %v1028_v13 = vpop.permute.xlu0 %1027 }
 0x120   : > { %v1512_v36 = vpop.permute.xlu1 %1511  ;;  %v1141_v42 = vsel %vm1125_vm8, %v1108_v8, %v1028_v13  ;;  %v792_v8 = vrot.slane %v5191_v1, 1  ;;  %v2578_v13 = vsel %vm924_vm7, %v4794_v11, %v2577_v37  ;;  %v961_v11 = vrot.slane %v5191_v1, 2 }
 0x121   : > { %v1624_v62 = vsel %vm1125_vm8, %v1592_v10, %v1512_v36  ;;  %3716 = vmatmul.mubr.msk.f32.gmra.mrb[14].mxu0 %vm1644_vm9, %v1141_v42  ;;  %1373 = vrot.lane.b32.xlu0 %v5161_v40, %s3992_s20 }
 0x122   : > { %3664 = vmatmul.mubr.msk.f32.gmra.mrb[14].mxu1 %vm1644_vm9, %v1624_v62  ;;  %2475 = vrot.lane.b32.xlu1 %v4802_v54, %s3992_s20  ;;  %v794_v42 = vsel %vm755_vm4, %v792_v8, %v793_v51 }
 0x123   : > { %v1346_v41 = vpop.permute.xlu0 %1345 }
 0x124   : > { %v2448_v17 = vpop.permute.xlu1 %2447  ;;  %v1593_v54 = vsel %vm634_vm1, %v5861_v60, %v1346_v41  ;;  %v5862_v60 = vld [vmem:[#allocation14_spill] sm:$0xff] }
 0x125   : > { %1375 = vrot.lane.b32.xlu0 %v1312_v53, %s3992_s20  ;;  %v2711_v39 = vsel %vm634_vm1, %v3922_v38, %v2448_v17  ;;  %v962_v53 = vrot.slane %v5193_v14, 2 }
 0x126   : > { %1541 = vrot.lane.b32.xlu1 %v5180_v26, %s3993_s28 }
 0x127   : > { %v1348_v32 = vpop.permute.xlu0 %1347 }
 0x128   : > { %v1514_v23 = vpop.permute.xlu1 %1513 }
 0x129   : > { %v1625_v27 = vsel %vm1125_vm8, %v1593_v54, %v1514_v23  ;;  %2477 = vrot.lane.b32.xlu0 %v2410_v61, %s3992_s20  ;;  %v1594_v54 = vsel %vm634_vm1, %v5862_v60, %v1348_v32 }
 0x12a   : > { %3666 = vmatprep.mubr.msk.f32.mxu1 %vm1644_vm9, %v1625_v27  ;;  %2643 = vrot.lane.b32.xlu1 %v4818_v44, %s3993_s28  ;;  %v5208_v44 = vld [vmem:[#allocation2 + $0xb0] sm:$0xff]  ;;  %v963_v27 = vsel %vm924_vm7, %v961_v11, %v962_v53  ;;  %v699_v11 = vld [vmem:[#allocation2 + $0xc0] sm:$0x3] }
 0x12b   : > { %v2450_v36 = vpop.permute.xlu0 %2449  ;;  %v795_v18 = vrot.slane %v5208_v44, 1  ;;  %v964_v38 = vrot.slane %v5208_v44, 2 }
 0x12c   : > { %v2616_v10 = vpop.permute.xlu1 %2615  ;;  %v2712_v17 = vsel %vm634_vm1, %v3923_v24, %v2450_v36 }
 0x12d   : > { %v2743_v62 = vsel %vm1125_vm8, %v2711_v39, %v2616_v10  ;;  %1543 = vrot.lane.b32.xlu0 %v1480_v25, %s3993_s28  ;;  %v796_v8 = vsel %vm755_vm4, %v793_v51, %v795_v18  ;;  %v5863_v39 = vld [vmem:[#allocation15_spill] sm:$0xff]  ;;  %v965_v51 = vsel %vm924_vm7, %v962_v53, %v964_v38  ;;  %v799_v53 = vrot.slane %v699_v11, 1 }
 0x12e   : > { %3746 = vmatprep.mubr.msk.f32.mxu0 %vm1644_vm9, %v2743_v62  ;;  %2645 = vrot.lane.b32.xlu1 %v2578_v13, %s3993_s28  ;;  %v5234_v13 = vld [vmem:[#allocation2 + $0xb8] sm:$0xff] }
 0x12f   : > { %v1516_v61 = vpop.permute.xlu0 %1515  ;;  %v797_v62 = vrot.slane %v5234_v13, 1 }
 0x130   : > { %v2618_v41 = vpop.permute.xlu1 %2617  ;;  %v1626_v37 = vsel %vm1125_vm8, %v1594_v54, %v1516_v61 }
 0x131   : > { %v2744_v23 = vsel %vm1125_vm8, %v2712_v17, %v2618_v41  ;;  %860 = vrot.lane.b32.xlu0 %v794_v42, %s3992_s20  ;;  %3667 = vmatmul.mubr.msk.f32.gmra.mrb[16].mxu1 %vm1644_vm9, %v1626_v37  ;;  %v3924_v42 = vld [vmem:[#allocation2 + $0x60] sm:$0xff] }
 0x132   : > { %3747 = vmatmul.mubr.msk.f32.vlgmr.msra.gmra.mrb[0].mxu0 %vm1644_vm9, %v2744_v23  ;;  %2479 = vrot.lane.b32.xlu1 %v4867_v58, %s3992_s20  ;;  %v3925_v23 = vld [vmem:[#allocation2 + $0x68] sm:$0xff] }
 0x133   : > { %v1350_v32 = vpop.permute.xlu0 %1349 }
 0x134   : > { %v2452_v56 = vpop.permute.xlu1 %2451  ;;  %v1595_v10 = vsel %vm634_vm1, %v5863_v39, %v1350_v32 }
 0x135   : > { %862 = vrot.lane.b32.xlu0 %v796_v8, %s3992_s20  ;;  %v2713_v24 = vsel %vm634_vm1, %v3924_v42, %v2452_v56 }
 0x136   : > { %1029 = vrot.lane.b32.xlu1 %v963_v27, %s3993_s28  ;;  %v2319_v27 = vld [vmem:[#allocation2 + $0x110] sm:$0x3] }
 0x137   : > { %v1352_v36 = vpop.permute.xlu0 %1351  ;;  %v2418_v32 = vrot.slane %v2319_v27, 1 }
 0x138   : > { %v1518_v58 = vpop.permute.xlu1 %1517  ;;  %v1596_v54 = vsel %vm634_vm1, %v4773_v19, %v1352_v36  ;;  %v968_v36 = vrot.slane %v699_v11, 2  ;;  %v3926_v11 = vld [vmem:[#allocation2 + $0x78] sm:$0xff] }
 0x139   : > { %v1627_v25 = vsel %vm1125_vm8, %v1595_v10, %v1518_v58  ;;  %2481 = vrot.lane.b32.xlu0 %v4882_v49, %s3992_s20  ;;  %v966_v49 = vrot.slane %v5234_v13, 2  ;;  %v2586_v58 = vrot.slane %v2319_v27, 2 }
 0x13a   : > { %2647 = vrot.lane.b32.xlu1 %v4879_v34, %s3993_s28  ;;  %3669 = vmatprep.mubr.msk.f32.mxu1 %vm1644_vm9, %v1627_v25  ;;  %v798_v34 = vsel %vm755_vm4, %v795_v18, %v797_v62  ;;  %v800_v18 = vsel %vm755_vm4, %v797_v62, %v799_v53  ;;  %v5272_v62 = vld [vmem:[#allocation2 + $0xd0] sm:$0xff] }
 0x13b   : > { %v2454_v41 = vpop.permute.xlu0 %2453  ;;  %v967_v19 = vsel %vm924_vm7, %v964_v38, %v966_v49  ;;  %v5270_v38 = vld [vmem:[#allocation2 + $0xc8] sm:$0xff] }
 0x13c   : > { %v2620_v17 = vpop.permute.xlu1 %2619  ;;  %v2714_v61 = vsel %vm634_vm1, %v3925_v23, %v2454_v41  ;;  %v802_v41 = vrot.slane %v5272_v62, 1  ;;  %v971_v23 = vrot.slane %v5272_v62, 2 }
 0x13d   : > { %v2745_v60 = vsel %vm1125_vm8, %v2713_v24, %v2620_v17  ;;  %1031 = vrot.lane.b32.xlu0 %v965_v51, %s3993_s28  ;;  %v801_v17 = vrot.slane %v5270_v38, 1 }
 0x13e   : > { %2649 = vrot.lane.b32.xlu1 %v4902_v6, %s3993_s28  ;;  %3749 = vmatprep.mubr.msk.f32.mxu0 %vm1644_vm9, %v2745_v60 }
 0x13f   : > { %v1520_v56 = vpop.permute.xlu0 %1519 }
 0x140   : > { %v2622_v37 = vpop.permute.xlu1 %2621  ;;  %v1628_v8 = vsel %vm1125_vm8, %v1596_v54, %v1520_v56  ;;  %v5285_v54 = vld [vmem:[#allocation2 + $0xd8] sm:$0xff]  ;;  %v3927_v56 = vld [vmem:[#allocation2 + $0x80] sm:$0xff] }
 0x141   : > { %v2746_v6 = vsel %vm1125_vm8, %v2714_v61, %v2622_v37  ;;  %864 = vrot.lane.b32.xlu0 %v798_v34, %s3992_s20  ;;  %3670 = vmatmul.mubr.msk.f32.gmra.mrb[18].mxu1 %vm1644_vm9, %v1628_v8  ;;  %v804_v61 = vrot.slane %v5285_v54, 1 }
 0x142   : > { %2483 = vrot.lane.b32.xlu1 %v4922_v16, %s3992_s20  ;;  %3750 = vmatmul.mubr.msk.f32.gmra.mrb[2].mxu0 %vm1644_vm9, %v2746_v6  ;;  %v2419_v16 = vsel %vm755_vm4, %v4905_v63, %v2418_v32  ;;  %v2587_v63 = vsel %vm924_vm7, %v4914_v43, %v2586_v58  ;;  %v803_v43 = vsel %vm755_vm4, %v801_v17, %v802_v41 }
 0x143   : > { %v1354_v10 = vpop.permute.xlu0 %1353  ;;  %v805_v32 = vsel %vm755_vm4, %v802_v41, %v804_v61  ;;  %v704_v41 = vld [vmem:[#allocation2 + $0xe8] sm:$0x3] }
 0x144   : > { %v2456_v39 = vpop.permute.xlu1 %2455  ;;  %v1597_v25 = vsel %vm634_vm1, %v4837_v20, %v1354_v10  ;;  %v969_v20 = vsel %vm924_vm7, %v966_v49, %v968_v36  ;;  %v970_v49 = vrot.slane %v5270_v38, 2 }
 0x145   : > { %866 = vrot.lane.b32.xlu0 %v800_v18, %s3992_s20  ;;  %v2715_v60 = vsel %vm634_vm1, %v3926_v11, %v2456_v39 }
 0x146   : > { %1033 = vrot.lane.b32.xlu1 %v967_v19, %s3993_s28 }
 0x147   : > { %v1356_v42 = vpop.permute.xlu0 %1355 }
 0x148   : > { %v1522_v51 = vpop.permute.xlu1 %1521  ;;  %v1598_v37 = vsel %vm634_vm1, %v4839_v55, %v1356_v42  ;;  %v972_v55 = vsel %vm924_vm7, %v970_v49, %v971_v23 }
 0x149   : > { %v1629_v24 = vsel %vm1125_vm8, %v1597_v25, %v1522_v51  ;;  %2485 = vrot.lane.b32.xlu0 %v2419_v16, %s3992_s20  ;;  %v973_v16 = vrot.slane %v5285_v54, 2  ;;  %v5312_v25 = vld [vmem:[#allocation2 + $0xe0] sm:$0xff] }
 0x14a   : > { %2651 = vrot.lane.b32.xlu1 %v4934_v0, %s3993_s28  ;;  %3672 = vmatprep.mubr.msk.f32.mxu1 %vm1644_vm9, %v1629_v24  ;;  %v806_v24 = vrot.slane %v5312_v25, 1 }
 0x14b   : > { %v2458_v53 = vpop.permute.xlu0 %2457  ;;  %v974_v42 = vsel %vm924_vm7, %v971_v23, %v973_v16  ;;  %v2324_v23 = vld [vmem:[#allocation2 + $0x138] sm:$0x3] }
 0x14c   : > { %v2624_v34 = vpop.permute.xlu1 %2623  ;;  %v2716_v27 = vsel %vm634_vm1, %v3927_v56, %v2458_v53  ;;  %v3929_v53 = vld [vmem:[#allocation2 + $0x90] sm:$0xff]  ;;  %v2427_v56 = vrot.slane %v2324_v23, 1 }
 0x14d   : > { %v2747_v0 = vsel %vm1125_vm8, %v2715_v60, %v2624_v34  ;;  %1035 = vrot.lane.b32.xlu0 %v969_v20, %s3993_s28  ;;  %v808_v60 = vrot.slane %v704_v41, 1 }
 0x14e   : > { %2653 = vrot.lane.b32.xlu1 %v2587_v63, %s3993_s28  ;;  %3752 = vmatprep.mubr.msk.f32.mxu0 %vm1644_vm9, %v2747_v0  ;;  %v3928_v63 = vld [vmem:[#allocation2 + $0x88] sm:$0xff] }
 0x14f   : > { %v1524_v8 = vpop.permute.xlu0 %1523 }
 0x150   : > { %v2626_v6 = vpop.permute.xlu1 %2625  ;;  %v1630_v18 = vsel %vm1125_vm8, %v1598_v37, %v1524_v8  ;;  %v2595_v8 = vrot.slane %v2324_v23, 2 }
 0x151   : > { %v2748_v19 = vsel %vm1125_vm8, %v2716_v27, %v2626_v6  ;;  %868 = vrot.lane.b32.xlu0 %v803_v43, %s3992_s20  ;;  %3673 = vmatmul.mubr.msk.f32.gmra.mrb[20].mxu1 %vm1644_vm9, %v1630_v18 }
 0x152   : > { %2487 = vrot.lane.b32.xlu1 %v4969_v15, %s3992_s20  ;;  %3753 = vmatmul.mubr.msk.f32.gmra.mrb[4].mxu0 %vm1644_vm9, %v2748_v19  ;;  %v977_v19 = vrot.slane %v704_v41, 2 }
 0x153   : > { %v1358_v10 = vpop.permute.xlu0 %1357 }
 0x154   : > { %v2460_v39 = vpop.permute.xlu1 %2459  ;;  %v1599_v15 = vsel %vm634_vm1, %v4854_v45, %v1358_v10  ;;  %v5350_v10 = vld [vmem:[#allocation2 + $0xf8] sm:$0xff] }
 0x155   : > { %870 = vrot.lane.b32.xlu0 %v805_v32, %s3992_s20  ;;  %v2717_v45 = vsel %vm634_vm1, %v3928_v63, %v2460_v39  ;;  %v5348_v39 = vld [vmem:[#allocation2 + $0xf0] sm:$0xff]  ;;  %v5363_v63 = vld [vmem:[#allocation2 + $0x100] sm:$0xff] }
 0x156   : > { %1037 = vrot.lane.b32.xlu1 %v972_v55, %s3993_s28  ;;  %v982_v23 = vrot.slane %v5363_v63, 2 }
 0x157   : > { %v1360_v36 = vpop.permute.xlu0 %1359 }
 0x158   : > { %v1526_v58 = vpop.permute.xlu1 %1525  ;;  %v1600_v34 = vsel %vm634_vm1, %v4892_v35, %v1360_v36  ;;  %v3930_v36 = vld [vmem:[#allocation2 + $0xa0] sm:$0xff] }
 0x159   : > { %v1631_v51 = vsel %vm1125_vm8, %v1599_v15, %v1526_v58  ;;  %2489 = vrot.lane.b32.xlu0 %v4990_v5, %s3992_s20  ;;  %v975_v5 = vrot.slane %v5312_v25, 2  ;;  %v810_v15 = vrot.slane %v5348_v39, 1  ;;  %v811_v58 = vrot.slane %v5350_v10, 1 }
 0x15a   : > { %2655 = vrot.lane.b32.xlu1 %v4987_v4, %s3993_s28  ;;  %3675 = vmatprep.mubr.msk.f32.mxu1 %vm1644_vm9, %v1631_v51  ;;  %v807_v4 = vsel %vm755_vm4, %v804_v61, %v806_v24  ;;  %v809_v61 = vsel %vm755_vm4, %v806_v24, %v808_v60 }
 0x15b   : > { %v2462_v17 = vpop.permute.xlu0 %2461  ;;  %v976_v35 = vsel %vm924_vm7, %v973_v16, %v975_v5 }
 0x15c   : > { %v2628_v20 = vpop.permute.xlu1 %2627  ;;  %v2718_v0 = vsel %vm634_vm1, %v3929_v53, %v2462_v17  ;;  %v813_v17 = vrot.slane %v5363_v63, 1 }
 0x15d   : > { %v2749_v11 = vsel %vm1125_vm8, %v2717_v45, %v2628_v20  ;;  %1039 = vrot.lane.b32.xlu0 %v974_v42, %s3993_s28  ;;  %v979_v45 = vrot.slane %v5348_v39, 2  ;;  %v980_v20 = vrot.slane %v5350_v10, 2 }
 0x15e   : > { %2657 = vrot.lane.b32.xlu1 %v5013_v9, %s3993_s28  ;;  %3755 = vmatprep.mubr.msk.f32.mxu0 %vm1644_vm9, %v2749_v11  ;;  %v3931_v11 = vld [vmem:[#allocation2 + $0xa8] sm:$0xff] }
 0x15f   : > { %v1528_v49 = vpop.permute.xlu0 %1527 }
 0x160   : > { %v2630_v43 = vpop.permute.xlu1 %2629  ;;  %v1632_v37 = vsel %vm1125_vm8, %v1600_v34, %v1528_v49 }
 0x161   : > { %v2750_v9 = vsel %vm1125_vm8, %v2718_v0, %v2630_v43  ;;  %872 = vrot.lane.b32.xlu0 %v807_v4, %s3992_s20  ;;  %3676 = vmatmul.mubr.msk.f32.gmra.mrb[22].mxu1 %vm1644_vm9, %v1632_v37  ;;  %v814_v0 = vsel %vm755_vm4, %v811_v58, %v813_v17 }
 0x162   : > { %2491 = vrot.lane.b32.xlu1 %v5023_v50, %s3992_s20  ;;  %3756 = vmatmul.mubr.msk.f32.gmra.mrb[6].mxu0 %vm1644_vm9, %v2750_v9  ;;  %v2428_v50 = vsel %vm755_vm4, %v5008_v2, %v2427_v56  ;;  %v2596_v2 = vsel %vm924_vm7, %v5030_v46, %v2595_v8  ;;  %v812_v46 = vsel %vm755_vm4, %v810_v15, %v811_v58  ;;  %v2329_v58 = vld [vmem:[#allocation2 + $0x160] sm:$0x3] }
 0x163   : > { %v1362_v6 = vpop.permute.xlu0 %1361  ;;  %v983_v56 = vsel %vm924_vm7, %v980_v20, %v982_v23 }
 0x164   : > { %v2464_v27 = vpop.permute.xlu1 %2463  ;;  %v1601_v18 = vsel %vm634_vm1, %v4945_v47, %v1362_v6  ;;  %v978_v47 = vsel %vm924_vm7, %v975_v5, %v977_v19  ;;  %v3932_v6 = vld [vmem:[#allocation2 + $0xb0] sm:$0xff] }
 0x165   : > { %874 = vrot.lane.b32.xlu0 %v809_v61, %s3992_s20  ;;  %v2719_v51 = vsel %vm634_vm1, %v3930_v36, %v2464_v27  ;;  %v709_v19 = vld [vmem:[#allocation2 + $0x110] sm:$0x3] }
 0x166   : > { %1041 = vrot.lane.b32.xlu1 %v976_v35, %s3993_s28  ;;  %v5390_v35 = vld [vmem:[#allocation2 + $0x108] sm:$0xff] }
 0x167   : > { %v1364_v32 = vpop.permute.xlu0 %1363  ;;  %v815_v27 = vrot.slane %v5390_v35, 1 }
 0x168   : > { %v1530_v55 = vpop.permute.xlu1 %1529  ;;  %v1602_v41 = vsel %vm634_vm1, %v4947_v57, %v1364_v32  ;;  %v981_v57 = vsel %vm924_vm7, %v979_v45, %v980_v20  ;;  %v986_v20 = vrot.slane %v709_v19, 2 }
 0x169   : > { %v1633_v16 = vsel %vm1125_vm8, %v1601_v18, %v1530_v55  ;;  %2493 = vrot.lane.b32.xlu0 %v2428_v50, %s3992_s20  ;;  %v817_v55 = vrot.slane %v709_v19, 1  ;;  %v3935_v19 = vld [vmem:[#allocation2 + $0xd0] sm:$0xff] }
 0x16a   : > { %2659 = vrot.lane.b32.xlu1 %v5044_v48, %s3993_s28  ;;  %3678 = vmatprep.mubr.msk.f32.mxu1 %vm1644_vm9, %v1633_v16  ;;  %v3933_v16 = vld [vmem:[#allocation2 + $0xb8] sm:$0xff] }
 0x16b   : > { %v2466_v24 = vpop.permute.xlu0 %2465 }
 0x16c   : > { %v2632_v42 = vpop.permute.xlu1 %2631  ;;  %v2720_v4 = vsel %vm634_vm1, %v3931_v11, %v2466_v24  ;;  %v818_v24 = vsel %vm755_vm4, %v815_v27, %v817_v55  ;;  %v5465_v55 = vld [vmem:[#allocation2 + $0x178] sm:$0xff] }
 0x16d   : > { %v2751_v48 = vsel %vm1125_vm8, %v2719_v51, %v2632_v42  ;;  %1043 = vrot.lane.b32.xlu0 %v978_v47, %s3993_s28 }
 0x16e   : > { %2661 = vrot.lane.b32.xlu1 %v2596_v2, %s3993_s28  ;;  %3758 = vmatprep.mubr.msk.f32.mxu0 %vm1644_vm9, %v2751_v48  ;;  %v2436_v48 = vrot.slane %v2329_v58, 1 }
 0x16f   : > { %v1532_v60 = vpop.permute.xlu0 %1531 }
 0x170   : > { %v2634_v5 = vpop.permute.xlu1 %2633  ;;  %v1634_v53 = vsel %vm1125_vm8, %v1602_v41, %v1532_v60  ;;  %v5428_v41 = vld [vmem:[#allocation2 + $0x168] sm:$0xff]  ;;  %v5432_v60 = vld [vmem:[#allocation2 + $0x170] sm:$0xff] }
 0x171   : > { %v2752_v34 = vsel %vm1125_vm8, %v2720_v4, %v2634_v5  ;;  %876 = vrot.lane.b32.xlu0 %v812_v46, %s3992_s20  ;;  %3679 = vmatmul.mubr.msk.f32.gmra.mrb[24].mxu1 %vm1644_vm9, %v1634_v53  ;;  %v5436_v53 = vld [vmem:[#allocation2 + $0x120] sm:$0xff] }
 0x172   : > { %2495 = vrot.lane.b32.xlu1 %v5098_v22, %s3992_s20  ;;  %3759 = vmatmul.mubr.msk.f32.gmra.mrb[8].mxu0 %vm1644_vm9, %v2752_v34  ;;  %v5434_v34 = vld [vmem:[#allocation2 + $0x118] sm:$0xff] }
 0x173   : > { %v1366_v49 = vpop.permute.xlu0 %1365 }
 0x174   : > { %v2468_v43 = vpop.permute.xlu1 %2467  ;;  %v1603_v22 = vsel %vm634_vm1, %v4963_v28, %v1366_v49  ;;  %v819_v49 = vrot.slane %v5434_v34, 1 }
 0x175   : > { %878 = vrot.lane.b32.xlu0 %v814_v0, %s3992_s20  ;;  %v2721_v28 = vsel %vm634_vm1, %v3932_v6, %v2468_v43  ;;  %v2438_v0 = vrot.slane %v5428_v41, 1  ;;  %v2439_v43 = vrot.slane %v5432_v60, 1 }
 0x176   : > { %1045 = vrot.lane.b32.xlu1 %v981_v57, %s3993_s28 }
 0x177   : > { %v1368_v37 = vpop.permute.xlu0 %1367  ;;  %v2440_v6 = vsel %vm755_vm4, %v2438_v0, %v2439_v43 }
 0x178   : > { %v1534_v9 = vpop.permute.xlu1 %1533  ;;  %v1604_v32 = vsel %vm634_vm1, %v4999_v3, %v1368_v37 }
 0x179   : > { %v1635_v61 = vsel %vm1125_vm8, %v1603_v22, %v1534_v9  ;;  %2497 = vrot.lane.b32.xlu0 %v5123_v29, %s3992_s20  ;;  %v984_v29 = vrot.slane %v5390_v35, 2  ;;  %v3934_v22 = vld [vmem:[#allocation2 + $0xc8] sm:$0xff] }
 0x17a   : > { %2663 = vrot.lane.b32.xlu1 %v5120_v21, %s3993_s28  ;;  %3681 = vmatprep.mubr.msk.f32.mxu1 %vm1644_vm9, %v1635_v61  ;;  %v816_v21 = vsel %vm755_vm4, %v813_v17, %v815_v27  ;;  %v2437_v17 = vsel %vm755_vm4, %v5146_v12, %v2436_v48  ;;  %v5451_v61 = vld [vmem:[#allocation2 + $0x128] sm:$0xff]  ;;  %v989_v27 = vrot.slane %v5436_v53, 2  ;;  %v2609_v48 = vrot.slane %v5465_v55, 2 }
 0x17b   : > { %v2470_v8 = vpop.permute.xlu0 %2469  ;;  %v985_v3 = vsel %vm924_vm7, %v982_v23, %v984_v29  ;;  %v820_v23 = vrot.slane %v5436_v53, 1 }
 0x17c   : > { %v2636_v50 = vpop.permute.xlu1 %2635  ;;  %v2722_v2 = vsel %vm634_vm1, %v3933_v16, %v2470_v8 }
 0x17d   : > { %v2753_v18 = vsel %vm1125_vm8, %v2721_v28, %v2636_v50  ;;  %1047 = vrot.lane.b32.xlu0 %v983_v56, %s3993_s28  ;;  %v988_v56 = vrot.slane %v5434_v34, 2  ;;  %v821_v28 = vsel %vm755_vm4, %v819_v49, %v820_v23  ;;  %v822_v50 = vrot.slane %v5451_v61, 1 }
 0x17e   : > { %2665 = vrot.lane.b32.xlu1 %v5151_v31, %s3993_s28  ;;  %3761 = vmatprep.mubr.msk.f32.mxu0 %vm1644_vm9, %v2753_v18 }
 0x17f   : > { %v1536_v15 = vpop.permute.xlu0 %1535 }
 0x180   : > { %v2638_v47 = vpop.permute.xlu1 %2637  ;;  %v1636_v36 = vsel %vm1125_vm8, %v1604_v32, %v1536_v15  ;;  %v2607_v15 = vrot.slane %v5432_v60, 2 }
 0x181   : > { %v2754_v31 = vsel %vm1125_vm8, %v2722_v2, %v2638_v47  ;;  %v5413_v51 = vpop.f32.mrb[0].mxu1  ;;  %880 = vrot.lane.b32.xlu0 %v816_v21, %s3992_s20  ;;  %3682 = vmatmul.mubr.msk.f32.gmra.mrb[26].mxu1 %vm1644_vm9, %v1636_v36  ;;  %v990_v2 = vsel %vm924_vm7, %v988_v56, %v989_v27  ;;  %v2606_v47 = vrot.slane %v5428_v41, 2 }
 0x182   : > { %2499 = vrot.lane.b32.xlu1 %v5161_v40, %s3992_s20  ;;  %v5418_v42 = vpop.f32.mrb[1].mxu1  ;;  %3762 = vmatmul.mubr.msk.f32.gmra.mrb[10].mxu0 %vm1644_vm9, %v2754_v31  ;;  %v2604_v40 = vrot.slane %v2329_v58, 2  ;;  %v2441_v58 = vrot.slane %v5465_v55, 1 }
 0x183   : > { %v1370_v45 = vpop.permute.xlu0 %1369 }
 0x184   : > { %v2472_v46 = vpop.permute.xlu1 %2471  ;;  %v1605_v11 = vsel %vm634_vm1, %v5065_v59, %v1370_v45  ;;  %v2605_v12 = vsel %vm924_vm7, %v5168_v7, %v2604_v40  ;;  %v987_v59 = vsel %vm924_vm7, %v984_v29, %v986_v20 }
 0x185   : > { %882 = vrot.lane.b32.xlu0 %v818_v24, %s3992_s20  ;;  %v2442_v24 = vsel %vm755_vm4, %v2439_v43, %v2441_v58  ;;  %v3936_v43 = vld [vmem:[#allocation2 + $0xd8] sm:$0xff] }
 0x186   : > { %1049 = vrot.lane.b32.xlu1 %v985_v3, %s3993_s28  ;;  %v2608_v3 = vsel %vm924_vm7, %v2606_v47, %v2607_v15 }
 0x187   : > { %v1372_v5 = vpop.permute.xlu0 %1371 }
 0x188   : > { %v1538_v4 = vpop.permute.xlu1 %1537  ;;  %v1606_v8 = vsel %vm634_vm1, %v5067_v52, %v1372_v5  ;;  %v823_v52 = vsel %vm755_vm4, %v820_v23, %v822_v50 }
 0x189   : > { %v1637_v57 = vsel %vm1125_vm8, %v1605_v11, %v1538_v4  ;;  %2501 = vrot.lane.b32.xlu0 %v2437_v17, %s3992_s20  ;;  %v5486_v17 = vld [vmem:[#allocation2 + $0x180] sm:$0xff]  ;;  %v5488_v11 = vld [vmem:[#allocation2 + $0x130] sm:$0xff] }
 0x18a   : > { %2667 = vrot.lane.b32.xlu1 %v5180_v26, %s3993_s28  ;;  %3684 = vmatprep.mubr.msk.f32.mxu1 %vm1644_vm9, %v1637_v57  ;;  %v2723_v26 = vsel %vm634_vm1, %v3934_v22, %v2472_v46  ;;  %v991_v46 = vrot.slane %v5451_v61, 2  ;;  %v824_v0 = vrot.slane %v5488_v11, 1  ;;  %v993_v56 = vrot.slane %v5488_v11, 2 }
 0x18b   : > { %v2474_v37 = vpop.permute.xlu0 %2473 }
 0x18c   : > { %v2640_v9 = vpop.permute.xlu1 %2639  ;;  %v2724_v18 = vsel %vm634_vm1, %v3935_v19, %v2474_v37 }
 0x18d   : > { %v2755_v7 = vsel %vm1125_vm8, %v2723_v26, %v2640_v9  ;;  %1051 = vrot.lane.b32.xlu0 %v987_v59, %s3993_s28  ;;  %v2443_v59 = vrot.slane %v5486_v17, 1  ;;  %v714_v26 = vld [vmem:[#allocation2 + $0x138] sm:$0x3] }
 0x18e   : > { %2669 = vrot.lane.b32.xlu1 %v2605_v12, %s3993_s28  ;;  %3764 = vmatprep.mubr.msk.f32.mxu0 %vm1644_vm9, %v2755_v7  ;;  %v992_v12 = vsel %vm924_vm7, %v989_v27, %v991_v46  ;;  %v825_v7 = vsel %vm755_vm4, %v822_v50, %v824_v0  ;;  %v826_v27 = vrot.slane %v714_v26, 1 }
 0x18f   : > { %v1540_v29 = vpop.permute.xlu0 %1539  ;;  %v2444_v37 = vsel %vm755_vm4, %v2441_v58, %v2443_v59 }
 0x190   : > { %v2642_v21 = vpop.permute.xlu1 %2641  ;;  %v1638_v16 = vsel %vm1125_vm8, %v1606_v8, %v1540_v29  ;;  %v827_v50 = vsel %vm755_vm4, %v824_v0, %v826_v27 }
 0x191   : > { %v2756_v32 = vsel %vm1125_vm8, %v2724_v18, %v2642_v21  ;;  %884 = vrot.lane.b32.xlu0 %v821_v28, %s3992_s20  ;;  %3685 = vmatmul.mubr.msk.f32.gmra.mrb[28].mxu1 %vm1644_vm9, %v1638_v16  ;;  %v3937_v28 = vld [vmem:[#allocation2 + $0xe0] sm:$0xff]  ;;  %v2334_v21 = vld [vmem:[#allocation2 + $0x188] sm:$0x3]  ;;  %v2611_v16 = vrot.slane %v5486_v17, 2 }
 0x192   : > { %2503 = vrot.lane.b32.xlu1 %v2440_v6, %s3992_s20  ;;  %3765 = vmatmul.mubr.msk.f32.gmra.mrb[12].mxu0 %vm1644_vm9, %v2756_v32 }
 0x193   : > { %v1374_v36 = vpop.permute.xlu0 %1373 }
 0x194   : > { %v2476_v31 = vpop.permute.xlu1 %2475  ;;  %v1607_v45 = vsel %vm634_vm1, %v5091_v30, %v1374_v36  ;;  %v2610_v30 = vsel %vm924_vm7, %v2607_v15, %v2609_v48 }
 0x195   : > { %886 = vrot.lane.b32.xlu0 %v823_v52, %s3992_s20  ;;  %v2725_v49 = vsel %vm634_vm1, %v3936_v43, %v2476_v31  ;;  %v2612_v31 = vsel %vm924_vm7, %v2609_v48, %v2611_v16 }
 0x196   : > { %1053 = vrot.lane.b32.xlu1 %v990_v2, %s3993_s28  ;;  %v2445_v2 = vrot.slane %v2334_v21, 1 }
 0x197   : > { %v1376_v20 = vpop.permute.xlu0 %1375 }
 0x198   : > { %v1542_v40 = vpop.permute.xlu1 %1541  ;;  %v1608_v6 = vsel %vm634_vm1, %v5134_v33, %v1376_v20  ;;  %v994_v33 = vsel %vm924_vm7, %v991_v46, %v993_v56  ;;  %v2446_v36 = vsel %vm755_vm4, %v2443_v59, %v2445_v2 }
 0x199   : > { %v1639_v4 = vsel %vm1125_vm8, %v1607_v45, %v1542_v40  ;;  %v5491_v5 = vpop.f32.mrb[2].mxu1  ;;  %2505 = vrot.lane.b32.xlu0 %v2442_v24, %s3992_s20  ;;  %v995_v24 = vrot.slane %v714_v26, 2 }
 0x19a   : > { %v5493_v57 = vpop.f32.mrb[3].mxu1  ;;  %2671 = vrot.lane.b32.xlu1 %v2608_v3, %s3993_s28  ;;  %3687 = vmatprep.mubr.msk.f32.mxu1 %vm1644_vm9, %v1639_v4  ;;  %v2613_v3 = vrot.slane %v2334_v21, 2 }
 0x19b   : > { %v2478_v22 = vpop.permute.xlu0 %2477  ;;  %v996_v48 = vsel %vm924_vm7, %v993_v56, %v995_v24 }
 0x19c   : > { %v2644_v23 = vpop.permute.xlu1 %2643  ;;  %v2726_v8 = vsel %vm634_vm1, %v3937_v28, %v2478_v22  ;;  %v2614_v4 = vsel %vm924_vm7, %v2611_v16, %v2613_v3  ;;  %v3941_v16 = vld [vmem:[#allocation2 + $0x108] sm:$0xff] }
 0x19d   : > { %v2757_v9 = vsel %vm1125_vm8, %v2725_v49, %v2644_v23  ;;  %1055 = vrot.lane.b32.xlu0 %v992_v12, %s3993_s28  ;;  %v3939_v49 = vld [vmem:[#allocation2 + $0xf8] sm:$0xff] }
 0x19e   : > { %2673 = vrot.lane.b32.xlu1 %v2610_v30, %s3993_s28  ;;  %3767 = vmatprep.mubr.msk.f32.mxu0 %vm1644_vm9, %v2757_v9  ;;  %v3938_v30 = vld [vmem:[#allocation2 + $0xf0] sm:$0xff] }
 0x19f   : > { %v1544_v18 = vpop.permute.xlu0 %1543 }
 0x1a0   : > { %v2646_v19 = vpop.permute.xlu1 %2645  ;;  %v1640_v32 = vsel %vm1125_vm8, %v1608_v6, %v1544_v18  ;;  %v3940_v18 = vld [vmem:[#allocation2 + $0x100] sm:$0xff] }
 0x1a1   : > { %v2758_v29 = vsel %vm1125_vm8, %v2726_v8, %v2646_v19  ;;  %888 = vrot.lane.b32.xlu0 %v825_v7, %s3992_s20  ;;  %3688 = vmatmul.mubr.msk.f32.gmra.mrb[30].mxu1 %vm1644_vm9, %v1640_v32 }
 0x1a2   : > { %2507 = vrot.lane.b32.xlu1 %v2444_v37, %s3992_s20  ;;  %3768 = vmatmul.mubr.msk.f32.gmra.mrb[14].mxu0 %vm1644_vm9, %v2758_v29 }
 0x1a3   : > { %v861_v47 = vpop.permute.xlu0 %860 }
 0x1a4   : > { %v2480_v52 = vpop.permute.xlu1 %2479  ;;  %v1109_v46 = vsel %vm634_vm1, %v5191_v1, %v861_v47 }
 0x1a5   : > { %v5522_v15 = vpop.f32.mrb[4].mxu1  ;;  %890 = vrot.lane.b32.xlu0 %v827_v50, %s3992_s20  ;;  %v2727_v12 = vsel %vm634_vm1, %v3938_v30, %v2480_v52 }
 0x1a6   : > { %v5524_v58 = vpop.f32.mrb[5].mxu1  ;;  %1057 = vrot.lane.b32.xlu1 %v994_v33, %s3993_s28 }
 0x1a7   : > { %v863_v40 = vpop.permute.xlu0 %862 }
 0x1a8   : > { %v1030_v45 = vpop.permute.xlu1 %1029  ;;  %v1110_v43 = vsel %vm634_vm1, %v5193_v14, %v863_v40 }
 0x1a9   : > { %v1142_v20 = vsel %vm1125_vm8, %v1109_v46, %v1030_v45  ;;  %2509 = vrot.lane.b32.xlu0 %v2446_v36, %s3992_s20 }
 0x1aa   : > { %2675 = vrot.lane.b32.xlu1 %v2612_v31, %s3993_s28  ;;  %3718 = vmatprep.mubr.msk.f32.mxu1 %vm1644_vm9, %v1142_v20 }
 0x1ab   : > { %v2482_v0 = vpop.permute.xlu0 %2481 }
 0x1ac   : > { %v2648_v59 = vpop.permute.xlu1 %2647  ;;  %v2728_v23 = vsel %vm634_vm1, %v3939_v49, %v2482_v0 }
 0x1ad   : > { %v2759_v1 = vsel %vm1125_vm8, %v2727_v12, %v2648_v59  ;;  %1059 = vrot.lane.b32.xlu0 %v996_v48, %s3993_s28 }
 0x1ae   : > { %2677 = vrot.lane.b32.xlu1 %v2614_v4, %s3993_s28  ;;  %3770 = vmatprep.mubr.msk.f32.mxu0 %vm1644_vm9, %v2759_v1  ;;  %v3942_v4 = vld [vmem:[#allocation2 + $0x118] sm:$0xff]  ;;  %v3943_v1 = vld [vmem:[#allocation2 + $0x120] sm:$0xff] }
 0x1af   : > { %v1032_v26 = vpop.permute.xlu0 %1031 }
 0x1b0   : > { %v2650_v22 = vpop.permute.xlu1 %2649  ;;  %v1143_v37 = vsel %vm1125_vm8, %v1110_v43, %v1032_v26 }
 0x1b1   : > { %v2760_v9 = vsel %vm1125_vm8, %v2728_v23, %v2650_v22  ;;  %3719 = vmatmul.mubr.msk.f32.vlgmr.msra.gmra.mrb[16].mxu1 %vm1644_vm9, %v1143_v37 }
 0x1b2   : > { %3771 = vmatmul.mubr.msk.f32.gmra.mrb[16].mxu0 %vm1644_vm9, %v2760_v9 }
 0x1b3   : > { %v865_v56 = vpop.permute.xlu0 %864 }
 0x1b4   : > { %v2484_v7 = vpop.permute.xlu1 %2483  ;;  %v1111_v14 = vsel %vm634_vm1, %v5208_v44, %v865_v56 }
 0x1b5   : > { %v5550_v27 = vpop.f32.mrb[6].mxu1  ;;  %v2729_v21 = vsel %vm634_vm1, %v3940_v18, %v2484_v7 }
 0x1b6   : > { %v5552_v6 = vpop.f32.mrb[7].mxu1 }
 0x1b7   : > { %v867_v8 = vpop.permute.xlu0 %866 }
 0x1b8   : > { %v1034_v28 = vpop.permute.xlu1 %1033  ;;  %v1112_v50 = vsel %vm634_vm1, %v5234_v13, %v867_v8  ;;  %v3944_v8 = vld [vmem:[#allocation2 + $0x128] sm:$0xff] }
 0x1b9   : > { %v1144_v19 = vsel %vm1125_vm8, %v1111_v14, %v1034_v28 }
 0x1ba   : > { %3721 = vmatprep.mubr.msk.f32.mxu1 %vm1644_vm9, %v1144_v19 }
 0x1bb   : > { %v2486_v32 = vpop.permute.xlu0 %2485 }
 0x1bc   : > { %v2652_v29 = vpop.permute.xlu1 %2651  ;;  %v2730_v44 = vsel %vm634_vm1, %v3941_v16, %v2486_v32 }
 0x1bd   : > { %v2761_v33 = vsel %vm1125_vm8, %v2729_v21, %v2652_v29 }
 0x1be   : > { %3773 = vmatprep.mubr.msk.f32.mxu0 %vm1644_vm9, %v2761_v33  ;;  %v3945_v33 = vld [vmem:[#allocation2 + $0x130] sm:$0xff] }
 0x1bf   : > { %v1036_v52 = vpop.permute.xlu0 %1035 }
 0x1c0   : > { %v2654_v2 = vpop.permute.xlu1 %2653  ;;  %v1145_v31 = vsel %vm1125_vm8, %v1112_v50, %v1036_v52 }
 0x1c1   : > { %v2762_v47 = vsel %vm1125_vm8, %v2730_v44, %v2654_v2  ;;  %3722 = vmatmul.mubr.msk.f32.gmra.mrb[18].mxu1 %vm1644_vm9, %v1145_v31 }
 0x1c2   : > { %3774 = vmatmul.mubr.msk.f32.gmra.mrb[18].mxu0 %vm1644_vm9, %v2762_v47 }
 0x1c3   : > { %v869_v3 = vpop.permute.xlu0 %868 }
 0x1c4   : > { %v2488_v36 = vpop.permute.xlu1 %2487  ;;  %v1113_v13 = vsel %vm634_vm1, %v5270_v38, %v869_v3 }
 0x1c5   : > { %v5568_v24 = vpop.f32.mrb[8].mxu1  ;;  %v2731_v48 = vsel %vm634_vm1, %v3942_v4, %v2488_v36 }
 0x1c6   : > { %v5570_v46 = vpop.f32.mrb[9].mxu1 }
 0x1c7   : > { %v871_v40 = vpop.permute.xlu0 %870 }
 0x1c8   : > { %v1038_v45 = vpop.permute.xlu1 %1037  ;;  %v1114_v0 = vsel %vm634_vm1, %v5272_v62, %v871_v40  ;;  %v3946_v40 = vld [vmem:[#allocation2 + $0x140] sm:$0xff] }
 0x1c9   : > { %v1146_v20 = vsel %vm1125_vm8, %v1113_v13, %v1038_v45 }
 0x1ca   : > { %3724 = vmatprep.mubr.msk.f32.mxu1 %vm1644_vm9, %v1146_v20 }
 0x1cb   : > { %v2490_v12 = vpop.permute.xlu0 %2489 }
 0x1cc   : > { %v2656_v30 = vpop.permute.xlu1 %2655  ;;  %v2732_v38 = vsel %vm634_vm1, %v3943_v1, %v2490_v12 }
 0x1cd   : > { %v2763_v59 = vsel %vm1125_vm8, %v2731_v48, %v2656_v30 }
 0x1ce   : > { %3776 = vmatprep.mubr.msk.f32.mxu0 %vm1644_vm9, %v2763_v59  ;;  %v3947_v59 = vld [vmem:[#allocation2 + $0x148] sm:$0xff] }
 0x1cf   : > { %v1040_v49 = vpop.permute.xlu0 %1039 }
 0x1d0   : > { %v2658_v43 = vpop.permute.xlu1 %2657  ;;  %v1147_v22 = vsel %vm1125_vm8, %v1114_v0, %v1040_v49 }
 0x1d1   : > { %v2764_v23 = vsel %vm1125_vm8, %v2732_v38, %v2658_v43  ;;  %3725 = vmatmul.mubr.msk.f32.gmra.mrb[20].mxu1 %vm1644_vm9, %v1147_v22 }
 0x1d2   : > { %3777 = vmatmul.mubr.msk.f32.gmra.mrb[20].mxu0 %vm1644_vm9, %v2764_v23 }
 0x1d3   : > { %v873_v9 = vpop.permute.xlu0 %872 }
 0x1d4   : > { %v2492_v26 = vpop.permute.xlu1 %2491  ;;  %v1115_v62 = vsel %vm634_vm1, %v5285_v54, %v873_v9 }
 0x1d5   : > { %v5586_v37 = vpop.f32.mrb[10].mxu1  ;;  %v2733_v19 = vsel %vm634_vm1, %v3944_v8, %v2492_v26 }
 0x1d6   : > { %v5588_v7 = vpop.f32.mrb[11].mxu1 }
 0x1d7   : > { %v875_v14 = vpop.permute.xlu0 %874 }
 0x1d8   : > { %v1042_v56 = vpop.permute.xlu1 %1041  ;;  %v1116_v32 = vsel %vm634_vm1, %v5312_v25, %v875_v14  ;;  %v3948_v14 = vld [vmem:[#allocation2 + $0x150] sm:$0xff] }
 0x1d9   : > { %v1148_v28 = vsel %vm1125_vm8, %v1115_v62, %v1042_v56 }
 0x1da   : > { %3727 = vmatprep.mubr.msk.f32.mxu1 %vm1644_vm9, %v1148_v28 }
 0x1db   : > { %v2494_v21 = vpop.permute.xlu0 %2493 }
 0x1dc   : > { %v2660_v18 = vpop.permute.xlu1 %2659  ;;  %v2734_v54 = vsel %vm634_vm1, %v3945_v33, %v2494_v21 }
 0x1dd   : > { %v2765_v29 = vsel %vm1125_vm8, %v2733_v19, %v2660_v18 }
 0x1de   : > { %3779 = vmatprep.mubr.msk.f32.mxu0 %vm1644_vm9, %v2765_v29  ;;  %v3949_v29 = vld [vmem:[#allocation2 + $0x158] sm:$0xff] }
 0x1df   : > { %v1044_v16 = vpop.permute.xlu0 %1043 }
 0x1e0   : > { %v2662_v50 = vpop.permute.xlu1 %2661  ;;  %v1149_v2 = vsel %vm1125_vm8, %v1116_v32, %v1044_v16 }
 0x1e1   : > { %v2766_v44 = vsel %vm1125_vm8, %v2734_v54, %v2662_v50  ;;  %3728 = vmatmul.mubr.msk.f32.gmra.mrb[22].mxu1 %vm1644_vm9, %v1149_v2 }
 0x1e2   : > { %3780 = vmatmul.mubr.msk.f32.gmra.mrb[22].mxu0 %vm1644_vm9, %v2766_v44 }
 0x1e3   : > { %v877_v47 = vpop.permute.xlu0 %876 }
 0x1e4   : > { %v2496_v52 = vpop.permute.xlu1 %2495  ;;  %v1117_v25 = vsel %vm634_vm1, %v5348_v39, %v877_v47 }
 0x1e5   : > { %v5604_v31 = vpop.f32.mrb[12].mxu1  ;;  %v2735_v20 = vsel %vm634_vm1, %v3946_v40, %v2496_v52 }
 0x1e6   : > { %v5606_v36 = vpop.f32.mrb[13].mxu1 }
 0x1e7   : > { %v879_v13 = vpop.permute.xlu0 %878 }
 0x1e8   : > { %v1046_v3 = vpop.permute.xlu1 %1045  ;;  %v1118_v12 = vsel %vm634_vm1, %v5350_v10, %v879_v13 }
 0x1e9   : > { %v1150_v45 = vsel %vm1125_vm8, %v1117_v25, %v1046_v3 }
 0x1ea   : > { %3730 = vmatprep.mubr.msk.f32.mxu1 %vm1644_vm9, %v1150_v45 }
 0x1eb   : > { %v2498_v48 = vpop.permute.xlu0 %2497 }
 0x1ec   : > { %v2664_v4 = vpop.permute.xlu1 %2663  ;;  %v2736_v39 = vsel %vm634_vm1, %v3947_v59, %v2498_v48 }
 0x1ed   : > { %v2767_v30 = vsel %vm1125_vm8, %v2735_v20, %v2664_v4 }
 0x1ee   : > { %3782 = vmatprep.mubr.msk.f32.mxu0 %vm1644_vm9, %v2767_v30 }
 0x1ef   : > { %v1048_v1 = vpop.permute.xlu0 %1047 }
 0x1f0   : > { %v2666_v0 = vpop.permute.xlu1 %2665  ;;  %v1151_v43 = vsel %vm1125_vm8, %v1118_v12, %v1048_v1 }
 0x1f1   : > { %v2768_v38 = vsel %vm1125_vm8, %v2736_v39, %v2666_v0  ;;  %3731 = vmatmul.mubr.msk.f32.gmra.mrb[24].mxu1 %vm1644_vm9, %v1151_v43 }
 0x1f2   : > { %3783 = vmatmul.mubr.msk.f32.gmra.mrb[24].mxu0 %vm1644_vm9, %v2768_v38 }
 0x1f3   : > { %v881_v23 = vpop.permute.xlu0 %880 }
 0x1f4   : > { %v2500_v49 = vpop.permute.xlu1 %2499  ;;  %v1119_v10 = vsel %vm634_vm1, %v5363_v63, %v881_v23 }
 0x1f5   : > { %v5622_v22 = vpop.f32.mrb[14].mxu1  ;;  %v2737_v28 = vsel %vm634_vm1, %v3948_v14, %v2500_v49 }
 0x1f6   : > { %v5624_v26 = vpop.f32.mrb[15].mxu1 }
 0x1f7   : > { %v883_v62 = vpop.permute.xlu0 %882 }
 0x1f8   : > { %v1050_v9 = vpop.permute.xlu1 %1049  ;;  %v1120_v21 = vsel %vm634_vm1, %v5390_v35, %v883_v62  ;;  %v5643_v35 = vld [vmem:[%s5816_s5] ss:$0 sm:$0xff] }
 0x1f9   : > { %v1152_v56 = vsel %vm1125_vm8, %v1119_v10, %v1050_v9 }
 0x1fa   : > { %3733 = vmatprep.mubr.msk.f32.mxu1 %vm1644_vm9, %v1152_v56 }
 0x1fb   : > { %v2502_v19 = vpop.permute.xlu0 %2501 }
 0x1fc   : > { %v2668_v8 = vpop.permute.xlu1 %2667  ;;  %v2738_v63 = vsel %vm634_vm1, %v3949_v29, %v2502_v19 }
 0x1fd   : > { %v2769_v18 = vsel %vm1125_vm8, %v2737_v28, %v2668_v8 }
 0x1fe   : > { %3785 = vmatprep.mubr.msk.f32.mxu0 %vm1644_vm9, %v2769_v18 }
 0x1ff   : > { %v1052_v33 = vpop.permute.xlu0 %1051 }
 0x200   : > { %v2670_v32 = vpop.permute.xlu1 %2669  ;;  %v1153_v50 = vsel %vm1125_vm8, %v1120_v21, %v1052_v33 }
 0x201   : > { %v2770_v54 = vsel %vm1125_vm8, %v2738_v63, %v2670_v32  ;;  %3734 = vmatmul.mubr.msk.f32.gmra.mrb[26].mxu1 %vm1644_vm9, %v1153_v50 }
 0x202   : > { %3786 = vmatmul.mubr.msk.f32.gmra.mrb[26].mxu0 %vm1644_vm9, %v2770_v54 }
 0x203   : > { %v885_v44 = vpop.permute.xlu0 %884 }
 0x204   : > { %v2504_v16 = vpop.permute.xlu1 %2503  ;;  %v1121_v3 = vsel %vm634_vm1, %v5434_v34, %v885_v44 }
 0x205   : > { %v3748_v2 = vpop.f32.mrb[0].mxu0  ;;  %v2739_v4 = vsel %vm634_vm1, %v5428_v41, %v2504_v16 }
 0x206   : > { %v3814_v52 = vadd.f32 %v3748_v2, %v5413_v51  ;;  %v2943_v47 = vpop.f32.mrb[1].mxu0 }
 0x207   : > { %v3815_v25 = vadd.f32 %v2943_v47, %v5418_v42  ;;  %v887_v40 = vpop.permute.xlu0 %886 }
 0x208   : > { %v3142_v13 = vadd.f32 %v3814_v52, %v5643_v35  ;;  %v1054_v45 = vpop.permute.xlu1 %1053  ;;  %v1122_v59 = vsel %vm634_vm1, %v5436_v53, %v887_v40 }
 0x209   : > { %v3141_v51 = vadd.f32 %v3815_v25, %v5643_v35  ;;  %v1154_v20 = vsel %vm1125_vm8, %v1121_v3, %v1054_v45 }
 0x20a   : > { %v3174_v42 = vmax.f32 %v3142_v13, 0.0  ;;  %3736 = vmatprep.mubr.msk.f32.mxu1 %vm1644_vm9, %v1154_v20 }
 0x20b   : > { %v3173_v34 = vmax.f32 %v3141_v51, 0.0  ;;  %v2506_v30 = vpop.permute.xlu0 %2505 }
 0x20c   : > { %3206 = vst.msk [vmem:[%s5655_s18 + $0x8] sm:$0xff] %vm1125_vm8, %v3174_v42  ;;  %v2672_v48 = vpop.permute.xlu1 %2671  ;;  %v2740_v39 = vsel %vm634_vm1, %v5432_v60, %v2506_v30 }
 0x20d   : > { %3205 = vst.msk [vmem:[%s5655_s18] sm:$0xff] %vm1125_vm8, %v3173_v34  ;;  %v2771_v12 = vsel %vm1125_vm8, %v2739_v4, %v2672_v48 }
 0x20e   : > { %3788 = vmatprep.mubr.msk.f32.mxu0 %vm1644_vm9, %v2771_v12 }
 0x20f   : > { %v1056_v1 = vpop.permute.xlu0 %1055 }
 0x210   : > { %v2674_v0 = vpop.permute.xlu1 %2673  ;;  %v1155_v38 = vsel %vm1125_vm8, %v1122_v59, %v1056_v1 }
 0x211   : > { %v2772_v41 = vsel %vm1125_vm8, %v2740_v39, %v2674_v0  ;;  %3737 = vmatmul.mubr.msk.f32.gmra.mrb[28].mxu1 %vm1644_vm9, %v1155_v38 }
 0x212   : > { %3789 = vmatmul.mubr.msk.f32.gmra.mrb[28].mxu0 %vm1644_vm9, %v2772_v41 }
 0x213   : > { %v889_v49 = vpop.permute.xlu0 %888 }
 0x214   : > { %v2508_v43 = vpop.permute.xlu1 %2507  ;;  %v1123_v60 = vsel %vm634_vm1, %v5451_v61, %v889_v49 }
 0x215   : > { %v3751_v23 = vpop.f32.mrb[2].mxu0 }
 0x216   : > { %v3816_v10 = vadd.f32 %v3751_v23, %v5491_v5  ;;  %v2953_v53 = vpop.f32.mrb[3].mxu0  ;;  %v2741_v5 = vsel %vm634_vm1, %v5465_v55, %v2508_v43 }
 0x217   : > { %v3817_v9 = vadd.f32 %v2953_v53, %v5493_v57  ;;  %v891_v56 = vpop.permute.xlu0 %890 }
 0x218   : > { %v1058_v62 = vpop.permute.xlu1 %1057  ;;  %v3144_v14 = vadd.f32 %v3816_v10, %v5643_v35  ;;  %v1124_v57 = vsel %vm634_vm1, %v5488_v11, %v891_v56 }
 0x219   : > { %v1156_v28 = vsel %vm1125_vm8, %v1123_v60, %v1058_v62  ;;  %v3143_v8 = vadd.f32 %v3817_v9, %v5643_v35 }
 0x21a   : > { %3739 = vmatprep.mubr.msk.f32.mxu1 %vm1644_vm9, %v1156_v28  ;;  %v3176_v19 = vmax.f32 %v3144_v14, 0.0 }
 0x21b   : > { %v3175_v18 = vmax.f32 %v3143_v8, 0.0  ;;  %v2510_v29 = vpop.permute.xlu0 %2509 }
 0x21c   : > { %v2676_v21 = vpop.permute.xlu1 %2675  ;;  %3208 = vst.msk [vmem:[%s5655_s18 + $0x18] sm:$0xff] %vm1125_vm8, %v3176_v19  ;;  %v2742_v63 = vsel %vm634_vm1, %v5486_v17, %v2510_v29 }
 0x21d   : > { %v2773_v61 = vsel %vm1125_vm8, %v2741_v5, %v2676_v21  ;;  %3207 = vst.msk [vmem:[%s5655_s18 + $0x10] sm:$0xff] %vm1125_vm8, %v3175_v18 }
 0x21e   : > { %3791 = vmatprep.mubr.msk.f32.mxu0 %vm1644_vm9, %v2773_v61 }
 0x21f   : > { %v1060_v32 = vpop.permute.xlu0 %1059 }
 0x220   : > { %v2678_v55 = vpop.permute.xlu1 %2677  ;;  %v1157_v54 = vsel %vm1125_vm8, %v1124_v57, %v1060_v32 }
 0x221   : > { %v2774_v33 = vsel %vm1125_vm8, %v2742_v63, %v2678_v55  ;;  %3740 = vmatmul.mubr.msk.f32.gmra.mrb[30].mxu1 %vm1644_vm9, %v1157_v54 }
 0x222   : > { %3792 = vmatmul.mubr.msk.f32.gmra.mrb[30].mxu0 %vm1644_vm9, %v2774_v33 }
 0x225   : > { %v3754_v50 = vpop.f32.mrb[4].mxu0 }
 0x226   : > { %v3818_v16 = vadd.f32 %v3754_v50, %v5522_v15  ;;  %v2963_v44 = vpop.f32.mrb[5].mxu0 }
 0x227   : > { %v3819_v11 = vadd.f32 %v2963_v44, %v5524_v58 }
 0x228   : > { %v3146_v17 = vadd.f32 %v3818_v16, %v5643_v35 }
 0x229   : > { %v3145_v2 = vadd.f32 %v3819_v11, %v5643_v35 }
 0x22a   : > { %v3178_v52 = vmax.f32 %v3146_v17, 0.0 }
 0x22b   : > { %v3177_v47 = vmax.f32 %v3145_v2, 0.0 }
 0x22c   : > { %3210 = vst.msk [vmem:[%s5655_s18 + $0x28] sm:$0xff] %vm1125_vm8, %v3178_v52 }
 0x22d   : > { %3209 = vst.msk [vmem:[%s5655_s18 + $0x20] sm:$0xff] %vm1125_vm8, %v3177_v47 }
 0x235   : > { %v3757_v25 = vpop.f32.mrb[6].mxu0 }
 0x236   : > { %v3820_v3 = vadd.f32 %v3757_v25, %v5550_v27  ;;  %v2973_v13 = vpop.f32.mrb[7].mxu0 }
 0x237   : > { %v3821_v15 = vadd.f32 %v2973_v13, %v5552_v6 }
 0x238   : > { %v3148_v58 = vadd.f32 %v3820_v3, %v5643_v35 }
 0x239   : > { %v3147_v45 = vadd.f32 %v3821_v15, %v5643_v35 }
 0x23a   : > { %v3180_v40 = vmax.f32 %v3148_v58, 0.0 }
 0x23b   : > { %v3179_v51 = vmax.f32 %v3147_v45, 0.0 }
 0x23c   : > { %3212 = vst.msk [vmem:[%s5655_s18 + $0x38] sm:$0xff] %vm1125_vm8, %v3180_v40 }
 0x23d   : > { %3211 = vst.msk [vmem:[%s5655_s18 + $0x30] sm:$0xff] %vm1125_vm8, %v3179_v51 }
 0x245   : > { %v3760_v20 = vpop.f32.mrb[8].mxu0 }
 0x246   : > { %v3822_v42 = vadd.f32 %v3760_v20, %v5568_v24  ;;  %v2983_v34 = vpop.f32.mrb[9].mxu0 }
 0x247   : > { %v3823_v27 = vadd.f32 %v2983_v34, %v5570_v46 }
 0x248   : > { %v3150_v6 = vadd.f32 %v3822_v42, %v5643_v35 }
 0x249   : > { %v3149_v4 = vadd.f32 %v3823_v27, %v5643_v35 }
 0x24a   : > { %v3182_v48 = vmax.f32 %v3150_v6, 0.0 }
 0x24b   : > { %v3181_v30 = vmax.f32 %v3149_v4, 0.0 }
 0x24c   : > { %3214 = vst.msk [vmem:[%s5655_s18 + $0x48] sm:$0xff] %vm1125_vm8, %v3182_v48 }
 0x24d   : > { %3213 = vst.msk [vmem:[%s5655_s18 + $0x40] sm:$0xff] %vm1125_vm8, %v3181_v30 }
 0x255   : > { %v3763_v12 = vpop.f32.mrb[10].mxu0 }
 0x256   : > { %v3824_v59 = vadd.f32 %v3763_v12, %v5586_v37  ;;  %v2993_v39 = vpop.f32.mrb[11].mxu0 }
 0x257   : > { %v3825_v24 = vadd.f32 %v2993_v39, %v5588_v7 }
 0x258   : > { %v3152_v46 = vadd.f32 %v3824_v59, %v5643_v35 }
 0x259   : > { %v3151_v0 = vadd.f32 %v3825_v24, %v5643_v35 }
 0x25a   : > { %v3184_v1 = vmax.f32 %v3152_v46, 0.0 }
 0x25b   : > { %v3183_v41 = vmax.f32 %v3151_v0, 0.0 }
 0x25c   : > { %3216 = vst.msk [vmem:[%s5655_s18 + $0x58] sm:$0xff] %vm1125_vm8, %v3184_v1 }
 0x25d   : > { %3215 = vst.msk [vmem:[%s5655_s18 + $0x50] sm:$0xff] %vm1125_vm8, %v3183_v41 }
 0x265   : > { %v3766_v38 = vpop.f32.mrb[12].mxu0 }
 0x266   : > { %v3826_v43 = vadd.f32 %v3766_v38, %v5604_v31  ;;  %v3003_v49 = vpop.f32.mrb[13].mxu0 }
 0x267   : > { %v3827_v37 = vadd.f32 %v3003_v49, %v5606_v36 }
 0x268   : > { %v3154_v7 = vadd.f32 %v3826_v43, %v5643_v35 }
 0x269   : > { %v3153_v23 = vadd.f32 %v3827_v37, %v5643_v35 }
 0x26a   : > { %v3186_v10 = vmax.f32 %v3154_v7, 0.0 }
 0x26b   : > { %v3185_v53 = vmax.f32 %v3153_v23, 0.0 }
 0x26c   : > { %3218 = vst.msk [vmem:[%s5655_s18 + $0x68] sm:$0xff] %vm1125_vm8, %v3186_v10 }
 0x26d   : > { %3217 = vst.msk [vmem:[%s5655_s18 + $0x60] sm:$0xff] %vm1125_vm8, %v3185_v53 }
 0x275   : > { %v3769_v60 = vpop.f32.mrb[14].mxu0 }
 0x276   : > { %v3828_v9 = vadd.f32 %v3769_v60, %v5622_v22  ;;  %v3013_v62 = vpop.f32.mrb[15].mxu0 }
 0x277   : > { %v3829_v31 = vadd.f32 %v3013_v62, %v5624_v26 }
 0x278   : > { %v3156_v56 = vadd.f32 %v3828_v9, %v5643_v35 }
 0x279   : > { %v3155_v36 = vadd.f32 %v3829_v31, %v5643_v35 }
 0x27a   : > { %v3188_v14 = vmax.f32 %v3156_v56, 0.0 }
 0x27b   : > { %v3187_v28 = vmax.f32 %v3155_v36, 0.0 }
 0x27c   : > { %3220 = vst.msk [vmem:[%s5655_s18 + $0x78] sm:$0xff] %vm1125_vm8, %v3188_v14 }
 0x27d   : > { %3219 = vst.msk [vmem:[%s5655_s18 + $0x70] sm:$0xff] %vm1125_vm8, %v3187_v28 }
 0x284   : > { %v3720_v8 = vpop.f32.mrb[16].mxu1 }
 0x285   : > { %v3772_v19 = vpop.f32.mrb[16].mxu0  ;;  %v2215_v18 = vpop.f32.mrb[17].mxu1 }
 0x286   : > { %v3830_v5 = vadd.f32 %v3772_v19, %v3720_v8  ;;  %v3023_v22 = vpop.f32.mrb[17].mxu0 }
 0x287   : > { %v3831_v21 = vadd.f32 %v3023_v22, %v2215_v18 }
 0x288   : > { %v3158_v26 = vadd.f32 %v3830_v5, %v5643_v35 }
 0x289   : > { %v3157_v29 = vadd.f32 %v3831_v21, %v5643_v35 }
 0x28a   : > { %v3190_v61 = vmax.f32 %v3158_v26, 0.0 }
 0x28b   : > { %v3189_v57 = vmax.f32 %v3157_v29, 0.0 }
 0x28c   : > { %3222 = vst.msk [vmem:[%s5655_s18 + $0x88] sm:$0xff] %vm1125_vm8, %v3190_v61 }
 0x28d   : > { %3221 = vst.msk [vmem:[%s5655_s18 + $0x80] sm:$0xff] %vm1125_vm8, %v3189_v57 }
 0x294   : > { %v3723_v63 = vpop.f32.mrb[18].mxu1 }
 0x295   : > { %v3775_v55 = vpop.f32.mrb[18].mxu0  ;;  %v2225_v33 = vpop.f32.mrb[19].mxu1 }
 0x296   : > { %v3832_v32 = vadd.f32 %v3775_v55, %v3723_v63  ;;  %v3033_v54 = vpop.f32.mrb[19].mxu0 }
 0x297   : > { %v3833_v50 = vadd.f32 %v3033_v54, %v2225_v33 }
 0x298   : > { %v3160_v16 = vadd.f32 %v3832_v32, %v5643_v35 }
 0x299   : > { %v3159_v44 = vadd.f32 %v3833_v50, %v5643_v35 }
 0x29a   : > { %v3192_v11 = vmax.f32 %v3160_v16, 0.0 }
 0x29b   : > { %v3191_v17 = vmax.f32 %v3159_v44, 0.0 }
 0x29c   : > { %3224 = vst.msk [vmem:[%s5655_s18 + $0x98] sm:$0xff] %vm1125_vm8, %v3192_v11 }
 0x29d   : > { %3223 = vst.msk [vmem:[%s5655_s18 + $0x90] sm:$0xff] %vm1125_vm8, %v3191_v17 }
 0x2a4   : > { %v3726_v2 = vpop.f32.mrb[20].mxu1 }
 0x2a5   : > { %v3778_v52 = vpop.f32.mrb[20].mxu0  ;;  %v2235_v25 = vpop.f32.mrb[21].mxu1 }
 0x2a6   : > { %v3834_v47 = vadd.f32 %v3778_v52, %v3726_v2  ;;  %v3043_v3 = vpop.f32.mrb[21].mxu0 }
 0x2a7   : > { %v3835_v13 = vadd.f32 %v3043_v3, %v2235_v25 }
 0x2a8   : > { %v3162_v15 = vadd.f32 %v3834_v47, %v5643_v35 }
 0x2a9   : > { %v3161_v58 = vadd.f32 %v3835_v13, %v5643_v35 }
 0x2aa   : > { %v3194_v45 = vmax.f32 %v3162_v15, 0.0 }
 0x2ab   : > { %v3193_v40 = vmax.f32 %v3161_v58, 0.0 }
 0x2ac   : > { %3226 = vst.msk [vmem:[%s5655_s18 + $0xa8] sm:$0xff] %vm1125_vm8, %v3194_v45 }
 0x2ad   : > { %3225 = vst.msk [vmem:[%s5655_s18 + $0xa0] sm:$0xff] %vm1125_vm8, %v3193_v40 }
 0x2b4   : > { %v3729_v51 = vpop.f32.mrb[22].mxu1 }
 0x2b5   : > { %v3781_v20 = vpop.f32.mrb[22].mxu0  ;;  %v2245_v34 = vpop.f32.mrb[23].mxu1 }
 0x2b6   : > { %v3836_v42 = vadd.f32 %v3781_v20, %v3729_v51  ;;  %v3053_v27 = vpop.f32.mrb[23].mxu0 }
 0x2b7   : > { %v3837_v6 = vadd.f32 %v3053_v27, %v2245_v34 }
 0x2b8   : > { %v3164_v4 = vadd.f32 %v3836_v42, %v5643_v35 }
 0x2b9   : > { %v3163_v48 = vadd.f32 %v3837_v6, %v5643_v35 }
 0x2ba   : > { %v3196_v30 = vmax.f32 %v3164_v4, 0.0 }
 0x2bb   : > { %v3195_v12 = vmax.f32 %v3163_v48, 0.0 }
 0x2bc   : > { %3228 = vst.msk [vmem:[%s5655_s18 + $0xb8] sm:$0xff] %vm1125_vm8, %v3196_v30 }
 0x2bd   : > { %3227 = vst.msk [vmem:[%s5655_s18 + $0xb0] sm:$0xff] %vm1125_vm8, %v3195_v12 }
 0x2c4   : > { %v3732_v59 = vpop.f32.mrb[24].mxu1 }
 0x2c5   : > { %v3784_v39 = vpop.f32.mrb[24].mxu0  ;;  %v2255_v46 = vpop.f32.mrb[25].mxu1 }
 0x2c6   : > { %v3838_v24 = vadd.f32 %v3784_v39, %v3732_v59  ;;  %v3063_v0 = vpop.f32.mrb[25].mxu0 }
 0x2c7   : > { %v3839_v1 = vadd.f32 %v3063_v0, %v2255_v46 }
 0x2c8   : > { %v3166_v41 = vadd.f32 %v3838_v24, %v5643_v35 }
 0x2c9   : > { %v3165_v38 = vadd.f32 %v3839_v1, %v5643_v35 }
 0x2ca   : > { %v3198_v43 = vmax.f32 %v3166_v41, 0.0 }
 0x2cb   : > { %v3197_v49 = vmax.f32 %v3165_v38, 0.0 }
 0x2cc   : > { %3230 = vst.msk [vmem:[%s5655_s18 + $0xc8] sm:$0xff] %vm1125_vm8, %v3198_v43 }
 0x2cd   : > { %3229 = vst.msk [vmem:[%s5655_s18 + $0xc0] sm:$0xff] %vm1125_vm8, %v3197_v49 }
 0x2d4   : > { %v3735_v37 = vpop.f32.mrb[26].mxu1 }
 0x2d5   : > { %v3787_v7 = vpop.f32.mrb[26].mxu0  ;;  %v2265_v10 = vpop.f32.mrb[27].mxu1 }
 0x2d6   : > { %v3840_v23 = vadd.f32 %v3787_v7, %v3735_v37  ;;  %v3073_v53 = vpop.f32.mrb[27].mxu0 }
 0x2d7   : > { %v3841_v60 = vadd.f32 %v3073_v53, %v2265_v10 }
 0x2d8   : > { %v3168_v9 = vadd.f32 %v3840_v23, %v5643_v35 }
 0x2d9   : > { %v3167_v62 = vadd.f32 %v3841_v60, %v5643_v35 }
 0x2da   : > { %v3200_v31 = vmax.f32 %v3168_v9, 0.0 }
 0x2db   : > { %v3199_v56 = vmax.f32 %v3167_v62, 0.0 }
 0x2dc   : > { %3232 = vst.msk [vmem:[%s5655_s18 + $0xd8] sm:$0xff] %vm1125_vm8, %v3200_v31 }
 0x2dd   : > { %3231 = vst.msk [vmem:[%s5655_s18 + $0xd0] sm:$0xff] %vm1125_vm8, %v3199_v56 }
 0x2e4   : > { %v3738_v36 = vpop.f32.mrb[28].mxu1 }
 0x2e5   : > { %v3790_v14 = vpop.f32.mrb[28].mxu0  ;;  %v2275_v8 = vpop.f32.mrb[29].mxu1 }
 0x2e6   : > { %v3842_v28 = vadd.f32 %v3790_v14, %v3738_v36  ;;  %v3083_v19 = vpop.f32.mrb[29].mxu0 }
 0x2e7   : > { %v3843_v5 = vadd.f32 %v3083_v19, %v2275_v8 }
 0x2e8   : > { %v3170_v18 = vadd.f32 %v3842_v28, %v5643_v35 }
 0x2e9   : > { %v3169_v22 = vadd.f32 %v3843_v5, %v5643_v35 }
 0x2ea   : > { %v3202_v21 = vmax.f32 %v3170_v18, 0.0 }
 0x2eb   : > { %v3201_v26 = vmax.f32 %v3169_v22, 0.0 }
 0x2ec   : > { %3234 = vst.msk [vmem:[%s5655_s18 + $0xe8] sm:$0xff] %vm1125_vm8, %v3202_v21 }
 0x2ed   : > { %3233 = vst.msk [vmem:[%s5655_s18 + $0xe0] sm:$0xff] %vm1125_vm8, %v3201_v26 }
 0x2f4   : > { %v3741_v29 = vpop.f32.mrb[30].mxu1 }
 0x2f5   : > { %v3793_v61 = vpop.f32.mrb[30].mxu0  ;;  %v2285_v63 = vpop.f32.mrb[31].mxu1 }
 0x2f6   : > { %v3844_v57 = vadd.f32 %v3793_v61, %v3741_v29  ;;  %v3093_v55 = vpop.f32.mrb[31].mxu0 }
 0x2f7   : > { %v3845_v32 = vadd.f32 %v3093_v55, %v2285_v63 }
 0x2f8   : > { %v3172_v33 = vadd.f32 %v3844_v57, %v5643_v35 }
 0x2f9   : > { %v3171_v54 = vadd.f32 %v3845_v32, %v5643_v35 }
 0x2fa   : > { %v3204_v50 = vmax.f32 %v3172_v33, 0.0 }
 0x2fb   : > { %v3203_v16 = vmax.f32 %v3171_v54, 0.0 }
 0x2fc   : > { %3236 = vst.msk [vmem:[%s5655_s18 + $0xf8] sm:$0xff] %vm1125_vm8, %v3204_v50 }
 0x2fd   : > { %3235 = vst.msk [vmem:[%s5655_s18 + $0xf0] sm:$0xff] %vm1125_vm8, %v3203_v16 }
 0x2fe PF: > { %s16_s25 = sadd.s32 1, %s3988_s25   ;;  %s5864_s21 = smov %s3980_s23 }
 0x2ff   : > { %p13_p10 = scmp.ge.s32.totalorder %s16_s25, 10   ;;  %s5865_s22 = smov %s3984_s24 }
 0x300   : > { %s5866_s23 = smov %s5869_s26  ;;  %s5867_s24 = smov %s5873_s27 }
 0x301   :  { %15 = sbr.rel (!%p13_p10) target bundleno = 3 (0x3), region = 89 }

</bundles_post_ra>
